<compile_context>
chip_gen: v7x
topology: tpu7x:2x2x1
jax: 0.10.0
libtpu: 0.0.40
codegen_flags: <defaults>
</compile_context>

<pallas_src>
import functools
import math

import jax
import jax.numpy as jnp
from jax.experimental import pallas as pl
from jax.experimental.pallas import tpu as pltpu


_VMEM_LIMIT = 64 * 1024 * 1024  # explicit scoped-VMEM budget (fits v5e/v6e/v7x)
_INV_SQRT2 = 1.0 / math.sqrt(2.0)


# ------------------------------- helpers ------------------------------------

def _pick_tile(total, target, quantum):
    """Largest tile <= target that is a multiple of `quantum` and divides `total`.

    Falls back to the full extent (always a legal TPU block dim)."""
    if total <= target:
        return total
    t = (target // quantum) * quantum
    while t >= quantum:
        if total % t == 0:
            return t
        t -= quantum
    return total


def _softshrink(v, lam):
    return jnp.where(v > lam, v - lam, jnp.where(v < -lam, v + lam, jnp.zeros_like(v)))


# ----------------------------- Pallas kernels ------------------------------

def _layernorm_kernel(x_ref, g_ref, b_ref, o_ref, *, eps):
    """LayerNorm over the last (lane) axis of a (rows, H*W) slab."""
    x = x_ref[...].astype(jnp.float32)
    mean = jnp.mean(x, axis=-1, keepdims=True)
    xc = x - mean
    var = jnp.mean(xc * xc, axis=-1, keepdims=True)
    inv = jax.lax.rsqrt(var + eps)
    o_ref[...] = (xc * inv * g_ref[...] + b_ref[...]).astype(o_ref.dtype)


def _make_add_layernorm_kernel(nin, eps):
    """Fused (sum of `nin` tensors) -> (sum output, LayerNorm output)."""
    def kernel(*refs):
        ins = refs[:nin]
        g_ref, b_ref, sum_ref, o_ref = refs[nin], refs[nin + 1], refs[nin + 2], refs[nin + 3]
        s = ins[0][...].astype(jnp.float32)
        for r in ins[1:]:
            s = s + r[...].astype(jnp.float32)
        sum_ref[...] = s.astype(sum_ref.dtype)
        mean = jnp.mean(s, axis=-1, keepdims=True)
        xc = s - mean
        var = jnp.mean(xc * xc, axis=-1, keepdims=True)
        inv = jax.lax.rsqrt(var + eps)
        o_ref[...] = (xc * inv * g_ref[...] + b_ref[...]).astype(o_ref.dtype)
    return kernel


def _afno_spectral_kernel(x_ref, w1_ref, b1_ref, w2_ref, b2_ref, o_ref, *,
                          lam, compute_dtype):
    """Stacked-real complex channel mixing, channel-first.

    x_ref:  (2C, ts)   stacked [x_real; x_imag], spatial in lanes
    w1_ref: (2Cf, 2C)  [[W1r^T, -W1i^T],[W1i^T, W1r^T]]   (bf16)
    w2_ref: (2C, 2Cf)  [[W2r^T, -W2i^T],[W2i^T, W2r^T]]   (bf16)
    o_ref:  (2C, ts)   stacked [o_real; o_imag] after softshrink
    """
    x = x_ref[...].astype(compute_dtype)
    h = jnp.dot(w1_ref[...], x, preferred_element_type=jnp.float32) + b1_ref[...]
    h = jnp.maximum(h, 0.0)                                  # ReLU on real & imag parts
    z = jnp.dot(w2_ref[...], h.astype(compute_dtype),
                preferred_element_type=jnp.float32) + b2_ref[...]
    o_ref[...] = _softshrink(z, lam).astype(o_ref.dtype)     # softshrink stays in f32


def _mlp_kernel(x_ref, w1_ref, b1_ref, w2_ref, b2_ref, res_ref, o_ref, *, compute_dtype):
    """1x1-conv MLP (channel-first): W2 @ gelu(W1 @ x + b1) + b2 + residual."""
    x = x_ref[...].astype(compute_dtype)                     # (C, ts)
    h = jnp.dot(w1_ref[...], x, preferred_element_type=jnp.float32) + b1_ref[...]
    h = 0.5 * h * (1.0 + jax.lax.erf(h * _INV_SQRT2))        # exact GELU, f32
    y = jnp.dot(w2_ref[...], h.astype(compute_dtype),
                preferred_element_type=jnp.float32) + b2_ref[...]
    o_ref[...] = (y + res_ref[...].astype(jnp.float32)).astype(o_ref.dtype)


# ----------------------------- kernel wrappers ------------------------------

def layernorm_hw(x, gamma, beta, eps=1e-5):
    """nn.LayerNorm((H, W)) on NCHW: normalize each (b, c) plane over H*W."""
    B, C, H, W = x.shape
    R, L = B * C, H * W
    target_rows = max(8, min(256, (4 << 20) // max(1, L * 4)))
    rt = _pick_tile(R, target_rows, 8)
    x2 = x.reshape(R, L)
    g2 = gamma.reshape(1, L).astype(jnp.float32)
    b2 = beta.reshape(1, L).astype(jnp.float32)
    row_spec = pl.BlockSpec((rt, L), lambda i: (i, 0))
    par_spec = pl.BlockSpec((1, L), lambda i: (0, 0))
    out = pl.pallas_call(
        functools.partial(_layernorm_kernel, eps=eps),
        out_shape=jax.ShapeDtypeStruct((R, L), x.dtype),
        grid=(R // rt,),
        in_specs=[row_spec, par_spec, par_spec],
        out_specs=row_spec,
        compiler_params=pltpu.CompilerParams(
            dimension_semantics=("parallel",), vmem_limit_bytes=_VMEM_LIMIT),
    )(x2, g2, b2)
    return out.reshape(B, C, H, W)


def add_layernorm_hw(inputs, gamma, beta, eps=1e-5):
    """Fused elementwise-sum of `inputs` + LayerNorm((H,W)); returns (sum, normed)."""
    B, C, H, W = inputs[0].shape
    R, L = B * C, H * W
    target_rows = max(8, min(256, (4 << 20) // max(1, L * 4)))
    rt = _pick_tile(R, target_rows, 8)
    nin = len(inputs)
    ins2 = [a.reshape(R, L) for a in inputs]
    g2 = gamma.reshape(1, L).astype(jnp.float32)
    b2 = beta.reshape(1, L).astype(jnp.float32)
    row_spec = pl.BlockSpec((rt, L), lambda i: (i, 0))
    par_spec = pl.BlockSpec((1, L), lambda i: (0, 0))
    s, o = pl.pallas_call(
        _make_add_layernorm_kernel(nin, eps),
        out_shape=(jax.ShapeDtypeStruct((R, L), inputs[0].dtype),
                   jax.ShapeDtypeStruct((R, L), inputs[0].dtype)),
        grid=(R // rt,),
        in_specs=[row_spec] * nin + [par_spec, par_spec],
        out_specs=(row_spec, row_spec),
        compiler_params=pltpu.CompilerParams(
            dimension_semantics=("parallel",), vmem_limit_bytes=_VMEM_LIMIT),
    )(*ins2, g2, b2)
    return s.reshape(B, C, H, W), o.reshape(B, C, H, W)


def afno_spectral(x_st, w1, b1, w2, b2, *, lam, compute_dtype):
    """x_st: (B, 2C, S) stacked real/imag spectral coeffs, spatial in lanes."""
    B, C2, S = x_st.shape
    Hf = w1.shape[0]
    ts = _pick_tile(S, 512, 128)
    act_spec = pl.BlockSpec((None, C2, ts), lambda b, j: (b, 0, j))
    return pl.pallas_call(
        functools.partial(_afno_spectral_kernel, lam=lam, compute_dtype=compute_dtype),
        out_shape=jax.ShapeDtypeStruct((B, C2, S), jnp.float32),
        grid=(B, S // ts),
        in_specs=[
            act_spec,
            pl.BlockSpec((Hf, C2), lambda b, j: (0, 0)),   # weights resident
            pl.BlockSpec((Hf, 1), lambda b, j: (0, 0)),
            pl.BlockSpec((C2, Hf), lambda b, j: (0, 0)),
            pl.BlockSpec((C2, 1), lambda b, j: (0, 0)),
        ],
        out_specs=act_spec,
        compiler_params=pltpu.CompilerParams(
            dimension_semantics=("parallel", "parallel"), vmem_limit_bytes=_VMEM_LIMIT),
    )(x_st, w1.astype(compute_dtype), b1, w2.astype(compute_dtype), b2)


def mlp_conv1x1(x, residual, p, *, compute_dtype):
    """1x1-conv MLP + residual, channel-first; x, residual: (B, C, H, W)."""
    B, C, H, W = x.shape
    S = H * W
    hidden = p["fc1_w"].shape[0]
    ts = _pick_tile(S, 512, 128)
    x3 = x.reshape(B, C, S)
    r3 = residual.reshape(B, C, S)
    act_spec = pl.BlockSpec((None, C, ts), lambda b, j: (b, 0, j))
    out = pl.pallas_call(
        functools.partial(_mlp_kernel, compute_dtype=compute_dtype),
        out_shape=jax.ShapeDtypeStruct((B, C, S), x.dtype),
        grid=(B, S // ts),
        in_specs=[
            act_spec,
            pl.BlockSpec((hidden, C), lambda b, j: (0, 0)),   # fc1 weight resident
            pl.BlockSpec((hidden, 1), lambda b, j: (0, 0)),
            pl.BlockSpec((C, hidden), lambda b, j: (0, 0)),   # fc2 weight resident
            pl.BlockSpec((C, 1), lambda b, j: (0, 0)),
            act_spec,
        ],
        out_specs=act_spec,
        compiler_params=pltpu.CompilerParams(
            dimension_semantics=("parallel", "parallel"), vmem_limit_bytes=_VMEM_LIMIT),
    )(x3, p["fc1_w"].astype(compute_dtype), p["fc1_b"],
      p["fc2_w"].astype(compute_dtype), p["fc2_b"], r3)
    return out.reshape(B, C, H, W)


# ------------------------------ Forward pass -------------------------------

def distributed_block_forward(x, p, *, sparsity_threshold=0.01,
                              hard_thresholding_fraction=1.0, double_skip=True,
                              compute_dtype=jnp.bfloat16):
    B, C, H, W = x.shape
    Wf = W // 2 + 1
    total_modes = H // 2 + 1
    kept_modes = int(total_modes * hard_thresholding_fraction)
    # TODO(synk): partial-spectrum hard thresholding (fraction < 1.0) not implemented.
    assert kept_modes == total_modes, "only full-spectrum (fraction=1.0) implemented"

    residual = x

    # ---- norm1 (Pallas, NCHW, reduce over H*W lanes) ----
    xn = layernorm_hw(x, p["norm1_w"], p["norm1_b"])

    # ---- DistributedAFNO2D filter (FFT in plain JAX; mixing in Pallas) ----
    xn_f32 = xn if xn.dtype == jnp.float32 else xn.astype(jnp.float32)
    Xc = jnp.fft.rfft2(xn_f32, axes=(-2, -1), norm="ortho")          # (B, C, H, Wf)
    S = H * Wf
    # Stack real/imag along the channel (sublane) axis -> no layout transpose needed.
    x_st = jnp.concatenate([jnp.real(Xc), jnp.imag(Xc)], axis=1).reshape(B, 2 * C, S)

    o_st = afno_spectral(x_st, p["afno_w1"], p["afno_b1"], p["afno_w2"], p["afno_b2"],
                         lam=sparsity_threshold, compute_dtype=compute_dtype)
    o_r = o_st[:, :C, :].reshape(B, C, H, Wf)
    o_i = o_st[:, C:, :].reshape(B, C, H, Wf)
    y = jnp.fft.irfft2(jax.lax.complex(o_r, o_i), s=(H, W),
                       axes=(-2, -1), norm="ortho").astype(x.dtype)

    # ---- fused: (ifft + filter-input bias [+ outer residual]) + norm2 (Pallas) ----
    adds = (y, xn, residual) if double_skip else (y, xn)
    x1, xn2 = add_layernorm_hw(adds, p["norm2_w"], p["norm2_b"])
    residual = x1 if double_skip else residual

    # ---- DistributedMLP (1x1 conv -> GELU -> 1x1 conv) + final residual (Pallas) ----
    return mlp_conv1x1(xn2, residual, p, compute_dtype=compute_dtype)


# ------------------------------ Param setup --------------------------------

def _block_diag(blocks):
    """blocks: (nb, r, c) -> (nb*r, nb*c) block-diagonal matrix (block-major order)."""
    nb, r, c = blocks.shape
    out = jnp.zeros((nb * r, nb * c), blocks.dtype)
    for k in range(nb):
        out = out.at[k * r:(k + 1) * r, k * c:(k + 1) * c].set(blocks[k])
    return out


def init_params(key, *, h, w, dim, num_blocks=8, mlp_ratio=4.0, hidden_size_factor=1):
    assert dim % num_blocks == 0
    bs = dim // num_blocks
    hidden = int(dim * mlp_ratio)
    keys = jax.random.split(key, 8)
    scale = 0.02

    # AFNO2D spectral weights, same shapes as the PyTorch module.
    w1 = scale * jax.random.normal(keys[0], (num_blocks, bs, bs * hidden_size_factor, 2), jnp.float32)
    b1 = scale * jax.random.normal(keys[1], (num_blocks, bs * hidden_size_factor, 1, 1, 2), jnp.float32)
    w2 = scale * jax.random.normal(keys[2], (num_blocks, bs * hidden_size_factor, bs, 2), jnp.float32)
    b2 = scale * jax.random.normal(keys[3], (num_blocks, bs, 1, 1, 2), jnp.float32)

    p = {}
    # LayerNorm((h, w)) default init: weight=1, bias=0.
    p["norm1_w"] = jnp.ones((h, w), jnp.float32)
    p["norm1_b"] = jnp.zeros((h, w), jnp.float32)
    p["norm2_w"] = jnp.ones((h, w), jnp.float32)
    p["norm2_b"] = jnp.zeros((h, w), jnp.float32)

    # Block-diagonal (block-major, matching view(B, nb, bs, ...)) channel mixing,
    # re-expressed in the channel-first stacked-real form:
    #   [o_r; o_i] = [[Wr^T, -Wi^T],[Wi^T, Wr^T]] @ [x_r; x_i]
    # NOTE: dense block-diag is acceptable only because bs is tiny in this demo.
    W1r, W1i = _block_diag(w1[..., 0]), _block_diag(w1[..., 1])     # (C, C*f)
    W2r, W2i = _block_diag(w2[..., 0]), _block_diag(w2[..., 1])     # (C*f, C)
    p["afno_w1"] = jnp.block([[W1r.T, -W1i.T], [W1i.T, W1r.T]])     # (2Cf, 2C)
    p["afno_w2"] = jnp.block([[W2r.T, -W2i.T], [W2i.T, W2r.T]])     # (2C, 2Cf)
    b1r = b1[:, :, 0, 0, 0].reshape(-1)
    b1i = b1[:, :, 0, 0, 1].reshape(-1)
    b2r = b2[:, :, 0, 0, 0].reshape(-1)
    b2i = b2[:, :, 0, 0, 1].reshape(-1)
    p["afno_b1"] = jnp.concatenate([b1r, b1i]).reshape(-1, 1)       # (2Cf, 1) f32
    p["afno_b2"] = jnp.concatenate([b2r, b2i]).reshape(-1, 1)       # (2C, 1) f32

    # MLP 1x1 convs, channel-first (Conv2d weight (out, in, 1, 1) -> (out, in)).
    p["fc1_w"] = scale * jax.random.normal(keys[4], (hidden, dim), jnp.float32)
    p["fc1_b"] = scale * jax.random.normal(keys[5], (hidden, 1), jnp.float32)
    p["fc2_w"] = scale * jax.random.normal(keys[6], (dim, hidden), jnp.float32)
    p["fc2_b"] = scale * jax.random.normal(keys[7], (dim, 1), jnp.float32)
    return p


# --------------------------------- Main -------------------------------------

if __name__ == "__main__":
    B, dim, h, w = 2, 16, 16, 16          # num_blocks=8 -> block_size=2, mlp hidden=64
    key = jax.random.PRNGKey(0)
    kx, kp = jax.random.split(key)
    x = jax.random.normal(kx, (B, dim, h, w), jnp.float32)
    params = init_params(kp, h=h, w=w, dim=dim, num_blocks=8, mlp_ratio=4.0)

    fwd = jax.jit(distributed_block_forward)
    out = fwd(x, params)
    jax.block_until_ready(out)

    assert out.shape == (B, dim, h, w), out.shape
    assert bool(jnp.all(jnp.isfinite(out)))
    print("KERNEL_OK")
</pallas_src>

<mosaic_0001>
module attributes {stable_mosaic.version = 11 : i64} {
  func.func @_layernorm_kernel(%arg0: i32, %arg1: memref<32x256xf32, #tpu.memory_space<vmem>>, %arg2: memref<1x256xf32, #tpu.memory_space<vmem>>, %arg3: memref<1x256xf32, #tpu.memory_space<vmem>>, %arg4: memref<32x256xf32, #tpu.memory_space<vmem>>) attributes {dimension_semantics = [#tpu.dimension_semantics<parallel>], iteration_bounds = array<i64: 1>, scalar_prefetch = 0 : i64, scratch_operands = 0 : i64, tpu.core_type = #tpu.core_type<tc>, window_params = [{transform_indices = @transform_0, window_bounds = array<i64: 32, 256>}, {pipeline_mode = #tpu.pipeline_mode<synchronous>, transform_indices = @transform_1, window_bounds = array<i64: 1, 256>}, {pipeline_mode = #tpu.pipeline_mode<synchronous>, transform_indices = @transform_2, window_bounds = array<i64: 1, 256>}, {transform_indices = @transform_3, window_bounds = array<i64: 32, 256>}]} {
    %c0 = arith.constant 0 : index
    %c0_0 = arith.constant 0 : index
    %0 = vector.load %arg1[%c0, %c0_0] : memref<32x256xf32, #tpu.memory_space<vmem>>, vector<32x256xf32>
    %cst = arith.constant dense<0.000000e+00> : vector<32xf32>
    %1 = vector.multi_reduction <add>, %0, %cst [1] : vector<32x256xf32> to vector<32xf32>
    %2 = vector.shape_cast %1 : vector<32xf32> to vector<32x1xf32>
    %cst_1 = arith.constant 2.560000e+02 : f32
    %3 = vector.broadcast %cst_1 : f32 to vector<32x1xf32>
    %4 = arith.divf %2, %3 : vector<32x1xf32>
    %5 = vector.broadcast %4 : vector<32x1xf32> to vector<32x256xf32>
    %6 = arith.subf %0, %5 : vector<32x256xf32>
    %7 = arith.mulf %6, %6 : vector<32x256xf32>
    %cst_2 = arith.constant dense<0.000000e+00> : vector<32xf32>
    %8 = vector.multi_reduction <add>, %7, %cst_2 [1] : vector<32x256xf32> to vector<32xf32>
    %9 = vector.shape_cast %8 : vector<32xf32> to vector<32x1xf32>
    %cst_3 = arith.constant 2.560000e+02 : f32
    %10 = vector.broadcast %cst_3 : f32 to vector<32x1xf32>
    %11 = arith.divf %9, %10 : vector<32x1xf32>
    %cst_4 = arith.constant 9.99999974E-6 : f32
    %12 = vector.broadcast %cst_4 : f32 to vector<32x1xf32>
    %13 = arith.addf %11, %12 : vector<32x1xf32>
    %14 = math.rsqrt %13 : vector<32x1xf32>
    %15 = vector.broadcast %14 : vector<32x1xf32> to vector<32x256xf32>
    %16 = arith.mulf %6, %15 : vector<32x256xf32>
    %c0_5 = arith.constant 0 : index
    %c0_6 = arith.constant 0 : index
    %17 = vector.load %arg2[%c0_5, %c0_6] : memref<1x256xf32, #tpu.memory_space<vmem>>, vector<1x256xf32>
    %18 = vector.broadcast %17 : vector<1x256xf32> to vector<32x256xf32>
    %19 = arith.mulf %16, %18 : vector<32x256xf32>
    %c0_7 = arith.constant 0 : index
    %c0_8 = arith.constant 0 : index
    %20 = vector.load %arg3[%c0_7, %c0_8] : memref<1x256xf32, #tpu.memory_space<vmem>>, vector<1x256xf32>
    %21 = vector.broadcast %20 : vector<1x256xf32> to vector<32x256xf32>
    %22 = arith.addf %19, %21 : vector<32x256xf32>
    %c0_9 = arith.constant 0 : index
    %c0_10 = arith.constant 0 : index
    %23 = vector.load %arg4[%c0_9, %c0_10] : memref<32x256xf32, #tpu.memory_space<vmem>>, vector<32x256xf32>
    tpu.vector_store %arg4[%c0_9, %c0_10], %22 {strides = array<i32>} : memref<32x256xf32, #tpu.memory_space<vmem>>, vector<32x256xf32>,
    return
  }
  func.func @transform_0(%arg0: i32) -> (i32, i32) {
    %c0_i32 = arith.constant 0 : i32
    %c0_i32_0 = arith.constant 0 : i32
    return %arg0, %c0_i32 : i32, i32
  }
  func.func @transform_1(%arg0: i32) -> (i32, i32) {
    %c0_i32 = arith.constant 0 : i32
    %c0_i32_0 = arith.constant 0 : i32
    %c0_i32_1 = arith.constant 0 : i32
    return %c0_i32, %c0_i32_0 : i32, i32
  }
  func.func @transform_2(%arg0: i32) -> (i32, i32) {
    %c0_i32 = arith.constant 0 : i32
    %c0_i32_0 = arith.constant 0 : i32
    %c0_i32_1 = arith.constant 0 : i32
    return %c0_i32, %c0_i32_0 : i32, i32
  }
  func.func @transform_3(%arg0: i32) -> (i32, i32) {
    %c0_i32 = arith.constant 0 : i32
    %c0_i32_0 = arith.constant 0 : i32
    return %arg0, %c0_i32 : i32, i32
  }
}

module attributes {stable_mosaic.version = 11 : i64} {
  func.func @_afno_spectral_kernel(%arg0: i32, %arg1: i32, %arg2: memref<1x32x144xf32, #tpu.memory_space<vmem>>, %arg3: memref<32x32xbf16, #tpu.memory_space<vmem>>, %arg4: memref<32x1xf32, #tpu.memory_space<vmem>>, %arg5: memref<32x32xbf16, #tpu.memory_space<vmem>>, %arg6: memref<32x1xf32, #tpu.memory_space<vmem>>, %arg7: memref<1x32x144xf32, #tpu.memory_space<vmem>>) attributes {dimension_semantics = [#tpu.dimension_semantics<parallel>, #tpu.dimension_semantics<parallel>], iteration_bounds = array<i64: 2, 1>, scalar_prefetch = 0 : i64, scratch_operands = 0 : i64, tpu.core_type = #tpu.core_type<tc>, window_params = [{transform_indices = @transform_0, window_bounds = array<i64: 1, 32, 144>}, {pipeline_mode = #tpu.pipeline_mode<synchronous>, transform_indices = @transform_1, window_bounds = array<i64: 32, 32>}, {pipeline_mode = #tpu.pipeline_mode<synchronous>, transform_indices = @transform_2, window_bounds = array<i64: 32, 1>}, {pipeline_mode = #tpu.pipeline_mode<synchronous>, transform_indices = @transform_3, window_bounds = array<i64: 32, 32>}, {pipeline_mode = #tpu.pipeline_mode<synchronous>, transform_indices = @transform_4, window_bounds = array<i64: 32, 1>}, {transform_indices = @transform_5, window_bounds = array<i64: 1, 32, 144>}]} {
    %c0 = arith.constant 0 : index
    %c0_0 = arith.constant 0 : index
    %c0_1 = arith.constant 0 : index
    %0 = vector.load %arg2[%c0, %c0_0, %c0_1] : memref<1x32x144xf32, #tpu.memory_space<vmem>>, vector<1x32x144xf32>
    %1 = vector.shape_cast %0 : vector<1x32x144xf32> to vector<32x144xf32>
    %2 = arith.truncf %1 : vector<32x144xf32> to vector<32x144xbf16>
    %c0_2 = arith.constant 0 : index
    %c0_3 = arith.constant 0 : index
    %3 = vector.load %arg3[%c0_2, %c0_3] : memref<32x32xbf16, #tpu.memory_space<vmem>>, vector<32x32xbf16>
    %cst = arith.constant dense<0.000000e+00> : vector<32x144xf32>
    %4 = tpu.matmul %3, %2, %cst {dimension_numbers = #tpu.dot_dimension_numbers<[1], [0], [0], [1], [0, 0, 1, 1], [], []>} : vector<32x32xbf16>, vector<32x144xbf16>, vector<32x144xf32> -> vector<32x144xf32>
    %c0_4 = arith.constant 0 : index
    %c0_5 = arith.constant 0 : index
    %5 = vector.load %arg4[%c0_4, %c0_5] : memref<32x1xf32, #tpu.memory_space<vmem>>, vector<32x1xf32>
    %6 = vector.broadcast %5 : vector<32x1xf32> to vector<32x144xf32>
    %7 = arith.addf %4, %6 : vector<32x144xf32>
    %cst_6 = arith.constant 0.000000e+00 : f32
    %8 = vector.broadcast %cst_6 : f32 to vector<32x144xf32>
    %9 = arith.maximumf %7, %8 : vector<32x144xf32>
    %c0_7 = arith.constant 0 : index
    %c0_8 = arith.constant 0 : index
    %10 = vector.load %arg5[%c0_7, %c0_8] : memref<32x32xbf16, #tpu.memory_space<vmem>>, vector<32x32xbf16>
    %11 = arith.truncf %9 : vector<32x144xf32> to vector<32x144xbf16>
    %cst_9 = arith.constant dense<0.000000e+00> : vector<32x144xf32>
    %12 = tpu.matmul %10, %11, %cst_9 {dimension_numbers = #tpu.dot_dimension_numbers<[1], [0], [0], [1], [0, 0, 1, 1], [], []>} : vector<32x32xbf16>, vector<32x144xbf16>, vector<32x144xf32> -> vector<32x144xf32>
    %c0_10 = arith.constant 0 : index
    %c0_11 = arith.constant 0 : index
    %13 = vector.load %arg6[%c0_10, %c0_11] : memref<32x1xf32, #tpu.memory_space<vmem>>, vector<32x1xf32>
    %14 = vector.broadcast %13 : vector<32x1xf32> to vector<32x144xf32>
    %15 = arith.addf %12, %14 : vector<32x144xf32>
    %cst_12 = arith.constant 0.00999999977 : f32
    %16 = vector.broadcast %cst_12 : f32 to vector<32x144xf32>
    %17 = arith.cmpf ogt, %15, %16 : vector<32x144xf32>
    %cst_13 = arith.constant 0.00999999977 : f32
    %18 = vector.broadcast %cst_13 : f32 to vector<32x144xf32>
    %19 = arith.subf %15, %18 : vector<32x144xf32>
    %cst_14 = arith.constant -0.00999999977 : f32
    %20 = vector.broadcast %cst_14 : f32 to vector<32x144xf32>
    %21 = arith.cmpf olt, %15, %20 : vector<32x144xf32>
    %cst_15 = arith.constant 0.00999999977 : f32
    %22 = vector.broadcast %cst_15 : f32 to vector<32x144xf32>
    %23 = arith.addf %15, %22 : vector<32x144xf32>
    %cst_16 = arith.constant 0.000000e+00 : f32
    %24 = vector.broadcast %cst_16 : f32 to vector<32x144xf32>
    %25 = arith.select %21, %23, %24 : vector<32x144xi1>, vector<32x144xf32>
    %26 = arith.select %17, %19, %25 : vector<32x144xi1>, vector<32x144xf32>
    %c0_17 = arith.constant 0 : index
    %c0_18 = arith.constant 0 : index
    %c0_19 = arith.constant 0 : index
    %27 = vector.load %arg7[%c0_17, %c0_18, %c0_19] : memref<1x32x144xf32, #tpu.memory_space<vmem>>, vector<1x32x144xf32>
    %28 = vector.shape_cast %27 : vector<1x32x144xf32> to vector<32x144xf32>
    %29 = vector.shape_cast %26 : vector<32x144xf32> to vector<1x32x144xf32>
    tpu.vector_store %arg7[%c0_17, %c0_18, %c0_19], %29 {strides = array<i32>} : memref<1x32x144xf32, #tpu.memory_space<vmem>>, vector<1x32x144xf32>,
    return
  }
  func.func @transform_0(%arg0: i32, %arg1: i32) -> (i32, i32, i32) {
    %c0_i32 = arith.constant 0 : i32
    %c0_i32_0 = arith.constant 0 : i32
    return %arg0, %c0_i32, %arg1 : i32, i32, i32
  }
  func.func @transform_1(%arg0: i32, %arg1: i32) -> (i32, i32) {
    %c0_i32 = arith.constant 0 : i32
    %c0_i32_0 = arith.constant 0 : i32
    %c0_i32_1 = arith.constant 0 : i32
    return %c0_i32, %c0_i32_0 : i32, i32
  }
  func.func @transform_2(%arg0: i32, %arg1: i32) -> (i32, i32) {
    %c0_i32 = arith.constant 0 : i32
    %c0_i32_0 = arith.constant 0 : i32
    %c0_i32_1 = arith.constant 0 : i32
    return %c0_i32, %c0_i32_0 : i32, i32
  }
  func.func @transform_3(%arg0: i32, %arg1: i32) -> (i32, i32) {
    %c0_i32 = arith.constant 0 : i32
    %c0_i32_0 = arith.constant 0 : i32
    %c0_i32_1 = arith.constant 0 : i32
    return %c0_i32, %c0_i32_0 : i32, i32
  }
  func.func @transform_4(%arg0: i32, %arg1: i32) -> (i32, i32) {
    %c0_i32 = arith.constant 0 : i32
    %c0_i32_0 = arith.constant 0 : i32
    %c0_i32_1 = arith.constant 0 : i32
    return %c0_i32, %c0_i32_0 : i32, i32
  }
  func.func @transform_5(%arg0: i32, %arg1: i32) -> (i32, i32, i32) {
    %c0_i32 = arith.constant 0 : i32
    %c0_i32_0 = arith.constant 0 : i32
    return %arg0, %c0_i32, %arg1 : i32, i32, i32
  }
}

module attributes {stable_mosaic.version = 11 : i64} {
  func.func @kernel(%arg0: i32, %arg1: memref<32x256xf32, #tpu.memory_space<vmem>>, %arg2: memref<32x256xf32, #tpu.memory_space<vmem>>, %arg3: memref<32x256xf32, #tpu.memory_space<vmem>>, %arg4: memref<1x256xf32, #tpu.memory_space<vmem>>, %arg5: memref<1x256xf32, #tpu.memory_space<vmem>>, %arg6: memref<32x256xf32, #tpu.memory_space<vmem>>, %arg7: memref<32x256xf32, #tpu.memory_space<vmem>>) attributes {dimension_semantics = [#tpu.dimension_semantics<parallel>], iteration_bounds = array<i64: 1>, scalar_prefetch = 0 : i64, scratch_operands = 0 : i64, tpu.core_type = #tpu.core_type<tc>, window_params = [{transform_indices = @transform_0, window_bounds = array<i64: 32, 256>}, {transform_indices = @transform_1, window_bounds = array<i64: 32, 256>}, {transform_indices = @transform_2, window_bounds = array<i64: 32, 256>}, {pipeline_mode = #tpu.pipeline_mode<synchronous>, transform_indices = @transform_3, window_bounds = array<i64: 1, 256>}, {pipeline_mode = #tpu.pipeline_mode<synchronous>, transform_indices = @transform_4, window_bounds = array<i64: 1, 256>}, {transform_indices = @transform_5, window_bounds = array<i64: 32, 256>}, {transform_indices = @transform_6, window_bounds = array<i64: 32, 256>}]} {
    %c0 = arith.constant 0 : index
    %c0_0 = arith.constant 0 : index
    %0 = vector.load %arg1[%c0, %c0_0] : memref<32x256xf32, #tpu.memory_space<vmem>>, vector<32x256xf32>
    %c0_1 = arith.constant 0 : index
    %c0_2 = arith.constant 0 : index
    %1 = vector.load %arg2[%c0_1, %c0_2] : memref<32x256xf32, #tpu.memory_space<vmem>>, vector<32x256xf32>
    %2 = arith.addf %0, %1 : vector<32x256xf32>
    %c0_3 = arith.constant 0 : index
    %c0_4 = arith.constant 0 : index
    %3 = vector.load %arg3[%c0_3, %c0_4] : memref<32x256xf32, #tpu.memory_space<vmem>>, vector<32x256xf32>
    %4 = arith.addf %2, %3 : vector<32x256xf32>
    %c0_5 = arith.constant 0 : index
    %c0_6 = arith.constant 0 : index
    %5 = vector.load %arg6[%c0_5, %c0_6] : memref<32x256xf32, #tpu.memory_space<vmem>>, vector<32x256xf32>
    tpu.vector_store %arg6[%c0_5, %c0_6], %4 {strides = array<i32>} : memref<32x256xf32, #tpu.memory_space<vmem>>, vector<32x256xf32>,
    %cst = arith.constant dense<0.000000e+00> : vector<32xf32>
    %6 = vector.multi_reduction <add>, %4, %cst [1] : vector<32x256xf32> to vector<32xf32>
    %7 = vector.shape_cast %6 : vector<32xf32> to vector<32x1xf32>
    %cst_7 = arith.constant 2.560000e+02 : f32
    %8 = vector.broadcast %cst_7 : f32 to vector<32x1xf32>
    %9 = arith.divf %7, %8 : vector<32x1xf32>
    %10 = vector.broadcast %9 : vector<32x1xf32> to vector<32x256xf32>
    %11 = arith.subf %4, %10 : vector<32x256xf32>
    %12 = arith.mulf %11, %11 : vector<32x256xf32>
    %cst_8 = arith.constant dense<0.000000e+00> : vector<32xf32>
    %13 = vector.multi_reduction <add>, %12, %cst_8 [1] : vector<32x256xf32> to vector<32xf32>
    %14 = vector.shape_cast %13 : vector<32xf32> to vector<32x1xf32>
    %cst_9 = arith.constant 2.560000e+02 : f32
    %15 = vector.broadcast %cst_9 : f32 to vector<32x1xf32>
    %16 = arith.divf %14, %15 : vector<32x1xf32>
    %cst_10 = arith.constant 9.99999974E-6 : f32
    %17 = vector.broadcast %cst_10 : f32 to vector<32x1xf32>
    %18 = arith.addf %16, %17 : vector<32x1xf32>
    %19 = math.rsqrt %18 : vector<32x1xf32>
    %20 = vector.broadcast %19 : vector<32x1xf32> to vector<32x256xf32>
    %21 = arith.mulf %11, %20 : vector<32x256xf32>
    %c0_11 = arith.constant 0 : index
    %c0_12 = arith.constant 0 : index
    %22 = vector.load %arg4[%c0_11, %c0_12] : memref<1x256xf32, #tpu.memory_space<vmem>>, vector<1x256xf32>
    %23 = vector.broadcast %22 : vector<1x256xf32> to vector<32x256xf32>
    %24 = arith.mulf %21, %23 : vector<32x256xf32>
    %c0_13 = arith.constant 0 : index
    %c0_14 = arith.constant 0 : index
    %25 = vector.load %arg5[%c0_13, %c0_14] : memref<1x256xf32, #tpu.memory_space<vmem>>, vector<1x256xf32>
    %26 = vector.broadcast %25 : vector<1x256xf32> to vector<32x256xf32>
    %27 = arith.addf %24, %26 : vector<32x256xf32>
    %c0_15 = arith.constant 0 : index
    %c0_16 = arith.constant 0 : index
    %28 = vector.load %arg7[%c0_15, %c0_16] : memref<32x256xf32, #tpu.memory_space<vmem>>, vector<32x256xf32>
    tpu.vector_store %arg7[%c0_15, %c0_16], %27 {strides = array<i32>} : memref<32x256xf32, #tpu.memory_space<vmem>>, vector<32x256xf32>,
    return
  }
  func.func @transform_0(%arg0: i32) -> (i32, i32) {
    %c0_i32 = arith.constant 0 : i32
    %c0_i32_0 = arith.constant 0 : i32
    return %arg0, %c0_i32 : i32, i32
  }
  func.func @transform_1(%arg0: i32) -> (i32, i32) {
    %c0_i32 = arith.constant 0 : i32
    %c0_i32_0 = arith.constant 0 : i32
    return %arg0, %c0_i32 : i32, i32
  }
  func.func @transform_2(%arg0: i32) -> (i32, i32) {
    %c0_i32 = arith.constant 0 : i32
    %c0_i32_0 = arith.constant 0 : i32
    return %arg0, %c0_i32 : i32, i32
  }
  func.func @transform_3(%arg0: i32) -> (i32, i32) {
    %c0_i32 = arith.constant 0 : i32
    %c0_i32_0 = arith.constant 0 : i32
    %c0_i32_1 = arith.constant 0 : i32
    return %c0_i32, %c0_i32_0 : i32, i32
  }
  func.func @transform_4(%arg0: i32) -> (i32, i32) {
    %c0_i32 = arith.constant 0 : i32
    %c0_i32_0 = arith.constant 0 : i32
    %c0_i32_1 = arith.constant 0 : i32
    return %c0_i32, %c0_i32_0 : i32, i32
  }
  func.func @transform_5(%arg0: i32) -> (i32, i32) {
    %c0_i32 = arith.constant 0 : i32
    %c0_i32_0 = arith.constant 0 : i32
    return %arg0, %c0_i32 : i32, i32
  }
  func.func @transform_6(%arg0: i32) -> (i32, i32) {
    %c0_i32 = arith.constant 0 : i32
    %c0_i32_0 = arith.constant 0 : i32
    return %arg0, %c0_i32 : i32, i32
  }
}

module attributes {stable_mosaic.version = 11 : i64} {
  func.func @_mlp_kernel(%arg0: i32, %arg1: i32, %arg2: memref<1x16x256xf32, #tpu.memory_space<vmem>>, %arg3: memref<64x16xbf16, #tpu.memory_space<vmem>>, %arg4: memref<64x1xf32, #tpu.memory_space<vmem>>, %arg5: memref<16x64xbf16, #tpu.memory_space<vmem>>, %arg6: memref<16x1xf32, #tpu.memory_space<vmem>>, %arg7: memref<1x16x256xf32, #tpu.memory_space<vmem>>, %arg8: memref<1x16x256xf32, #tpu.memory_space<vmem>>) attributes {dimension_semantics = [#tpu.dimension_semantics<parallel>, #tpu.dimension_semantics<parallel>], iteration_bounds = array<i64: 2, 1>, scalar_prefetch = 0 : i64, scratch_operands = 0 : i64, tpu.core_type = #tpu.core_type<tc>, window_params = [{transform_indices = @transform_0, window_bounds = array<i64: 1, 16, 256>}, {pipeline_mode = #tpu.pipeline_mode<synchronous>, transform_indices = @transform_1, window_bounds = array<i64: 64, 16>}, {pipeline_mode = #tpu.pipeline_mode<synchronous>, transform_indices = @transform_2, window_bounds = array<i64: 64, 1>}, {pipeline_mode = #tpu.pipeline_mode<synchronous>, transform_indices = @transform_3, window_bounds = array<i64: 16, 64>}, {pipeline_mode = #tpu.pipeline_mode<synchronous>, transform_indices = @transform_4, window_bounds = array<i64: 16, 1>}, {transform_indices = @transform_5, window_bounds = array<i64: 1, 16, 256>}, {transform_indices = @transform_6, window_bounds = array<i64: 1, 16, 256>}]} {
    %c0 = arith.constant 0 : index
    %c0_0 = arith.constant 0 : index
    %c0_1 = arith.constant 0 : index
    %0 = vector.load %arg2[%c0, %c0_0, %c0_1] : memref<1x16x256xf32, #tpu.memory_space<vmem>>, vector<1x16x256xf32>
    %1 = vector.shape_cast %0 : vector<1x16x256xf32> to vector<16x256xf32>
    %2 = arith.truncf %1 : vector<16x256xf32> to vector<16x256xbf16>
    %c0_2 = arith.constant 0 : index
    %c0_3 = arith.constant 0 : index
    %3 = vector.load %arg3[%c0_2, %c0_3] : memref<64x16xbf16, #tpu.memory_space<vmem>>, vector<64x16xbf16>
    %cst = arith.constant dense<0.000000e+00> : vector<64x256xf32>
    %4 = tpu.matmul %3, %2, %cst {dimension_numbers = #tpu.dot_dimension_numbers<[1], [0], [0], [1], [0, 0, 1, 1], [], []>} : vector<64x16xbf16>, vector<16x256xbf16>, vector<64x256xf32> -> vector<64x256xf32>
    %c0_4 = arith.constant 0 : index
    %c0_5 = arith.constant 0 : index
    %5 = vector.load %arg4[%c0_4, %c0_5] : memref<64x1xf32, #tpu.memory_space<vmem>>, vector<64x1xf32>
    %6 = vector.broadcast %5 : vector<64x1xf32> to vector<64x256xf32>
    %7 = arith.addf %4, %6 : vector<64x256xf32>
    %cst_6 = arith.constant 5.000000e-01 : f32
    %8 = vector.broadcast %cst_6 : f32 to vector<64x256xf32>
    %9 = arith.mulf %8, %7 : vector<64x256xf32>
    %cst_7 = arith.constant 0.707106769 : f32
    %10 = vector.broadcast %cst_7 : f32 to vector<64x256xf32>
    %11 = arith.mulf %7, %10 : vector<64x256xf32>
    %12 = math.erf %11 : vector<64x256xf32>
    %cst_8 = arith.constant 1.000000e+00 : f32
    %13 = vector.broadcast %cst_8 : f32 to vector<64x256xf32>
    %14 = arith.addf %13, %12 : vector<64x256xf32>
    %15 = arith.mulf %9, %14 : vector<64x256xf32>
    %c0_9 = arith.constant 0 : index
    %c0_10 = arith.constant 0 : index
    %16 = vector.load %arg5[%c0_9, %c0_10] : memref<16x64xbf16, #tpu.memory_space<vmem>>, vector<16x64xbf16>
    %17 = arith.truncf %15 : vector<64x256xf32> to vector<64x256xbf16>
    %cst_11 = arith.constant dense<0.000000e+00> : vector<16x256xf32>
    %18 = tpu.matmul %16, %17, %cst_11 {dimension_numbers = #tpu.dot_dimension_numbers<[1], [0], [0], [1], [0, 0, 1, 1], [], []>} : vector<16x64xbf16>, vector<64x256xbf16>, vector<16x256xf32> -> vector<16x256xf32>
    %c0_12 = arith.constant 0 : index
    %c0_13 = arith.constant 0 : index
    %19 = vector.load %arg6[%c0_12, %c0_13] : memref<16x1xf32, #tpu.memory_space<vmem>>, vector<16x1xf32>
    %20 = vector.broadcast %19 : vector<16x1xf32> to vector<16x256xf32>
    %21 = arith.addf %18, %20 : vector<16x256xf32>
    %c0_14 = arith.constant 0 : index
    %c0_15 = arith.constant 0 : index
    %c0_16 = arith.constant 0 : index
    %22 = vector.load %arg7[%c0_14, %c0_15, %c0_16] : memref<1x16x256xf32, #tpu.memory_space<vmem>>, vector<1x16x256xf32>
    %23 = vector.shape_cast %22 : vector<1x16x256xf32> to vector<16x256xf32>
    %24 = arith.addf %21, %23 : vector<16x256xf32>
    %c0_17 = arith.constant 0 : index
    %c0_18 = arith.constant 0 : index
    %c0_19 = arith.constant 0 : index
    %25 = vector.load %arg8[%c0_17, %c0_18, %c0_19] : memref<1x16x256xf32, #tpu.memory_space<vmem>>, vector<1x16x256xf32>
    %26 = vector.shape_cast %25 : vector<1x16x256xf32> to vector<16x256xf32>
    %27 = vector.shape_cast %24 : vector<16x256xf32> to vector<1x16x256xf32>
    tpu.vector_store %arg8[%c0_17, %c0_18, %c0_19], %27 {strides = array<i32>} : memref<1x16x256xf32, #tpu.memory_space<vmem>>, vector<1x16x256xf32>,
    return
  }
  func.func @transform_0(%arg0: i32, %arg1: i32) -> (i32, i32, i32) {
    %c0_i32 = arith.constant 0 : i32
    %c0_i32_0 = arith.constant 0 : i32
    return %arg0, %c0_i32, %arg1 : i32, i32, i32
  }
  func.func @transform_1(%arg0: i32, %arg1: i32) -> (i32, i32) {
    %c0_i32 = arith.constant 0 : i32
    %c0_i32_0 = arith.constant 0 : i32
    %c0_i32_1 = arith.constant 0 : i32
    return %c0_i32, %c0_i32_0 : i32, i32
  }
  func.func @transform_2(%arg0: i32, %arg1: i32) -> (i32, i32) {
    %c0_i32 = arith.constant 0 : i32
    %c0_i32_0 = arith.constant 0 : i32
    %c0_i32_1 = arith.constant 0 : i32
    return %c0_i32, %c0_i32_0 : i32, i32
  }
  func.func @transform_3(%arg0: i32, %arg1: i32) -> (i32, i32) {
    %c0_i32 = arith.constant 0 : i32
    %c0_i32_0 = arith.constant 0 : i32
    %c0_i32_1 = arith.constant 0 : i32
    return %c0_i32, %c0_i32_0 : i32, i32
  }
  func.func @transform_4(%arg0: i32, %arg1: i32) -> (i32, i32) {
    %c0_i32 = arith.constant 0 : i32
    %c0_i32_0 = arith.constant 0 : i32
    %c0_i32_1 = arith.constant 0 : i32
    return %c0_i32, %c0_i32_0 : i32, i32
  }
  func.func @transform_5(%arg0: i32, %arg1: i32) -> (i32, i32, i32) {
    %c0_i32 = arith.constant 0 : i32
    %c0_i32_0 = arith.constant 0 : i32
    return %arg0, %c0_i32, %arg1 : i32, i32, i32
  }
  func.func @transform_6(%arg0: i32, %arg1: i32) -> (i32, i32, i32) {
    %c0_i32 = arith.constant 0 : i32
    %c0_i32_0 = arith.constant 0 : i32
    return %arg0, %c0_i32, %arg1 : i32, i32, i32
  }
}

</mosaic_0001>

<bundles_post_ra>
// kernel: distributed_block_forward.4
= control target key start
LH: loop header
LB: loop body
LE: loop exit
PB: predicated region body
PF: predicated region fallthrough
CT: control target
= control target key end

     0   :  { %8 = vsyncpa [#allocation3], 0  ;;  %s396_s0 = inlined_call_operand.hbm [shape: f32[32,256], index: 0, kind: input, shape index: {}]   ;;  %s397_s1 = inlined_call_operand.hbm [shape: f32[1,256], index: 1, kind: input, shape index: {}]   ;;  %s398_s2 = inlined_call_operand.hbm [shape: f32[1,256], index: 2, kind: input, shape index: {}]   ;;  %s399_s3 = inlined_call_operand.hbm [shape: f32[32,256], index: 3, kind: output, shape index: {}]  }
   0x1   :  { %9 = vsyncpa [#allocation6], 0 }
   0x2   :  { %10 = vsyncpa [#allocation4], 0  ;;  %s299_s12 = smov [#allocation5]   ;;  %s300_s14 = smov [#allocation2]  }
   0x3   :  { %s29_s13 = sshll.u32 %s299_s12, 4  ;;  %s16_s15 = sshll.u32 %s300_s14, 4  ;;  %s30_s13 = int_to_ptr.vmem [resolvable:$true] %s29_s13  ;;  %s325_s15 = int_to_ptr.vmem [resolvable:$true] %s16_s15 }
   0x4   :  { %s205_s18 = scalar_lea.hbm %s397_s1, 32 }
   0x5   :  { %p206_p0 = scmp.ne.s32.totalorder %s397_s1, %s205_s18  ;;  %p209_p1 = scmp.lt.u32.totalorder %s205_s18, %s397_s1 }
   0x7   :  { %p211_p2 = pnand %p209_p1, %p206_p0 }
   0x9   :  { %214 = shalt.err (!%p211_p2)
}
   0xa   :  { %s215_s23 = scalar_lea.vmem %s30_s13, 32  ;;  %p220_p4 = scmp.lt.s32.totalorder %s30_s13, %s30_s13 }
   0xb   :  { %p216_p3 = scmp.ne.s32.totalorder %s30_s13, %s215_s23  ;;  %p221_p5 = scmp.lt.s32.totalorder %s215_s23, %s215_s23 }
   0xd   :  { %p222_p6 = por %p221_p5, %p220_p4 }
   0xf   :  { %p223_p7 = pnand %p222_p6, %p216_p3 }
  0x11   :  { %226 = shalt.err (!%p223_p7)
}
  0x12   :  { %32 = dma.hbm_to_vmem [thread:$0]  %s397_s1, 32, %s30_s13, [#allocation6]  }
  0x13   :  { %s227_s28 = scalar_lea.hbm %s396_s0, 1024 }
  0x14   :  { %p228_p8 = scmp.ne.s32.totalorder %s396_s0, %s227_s28  ;;  %p231_p9 = scmp.lt.u32.totalorder %s227_s28, %s396_s0 }
  0x16   :  { %p233_p10 = pnand %p231_p9, %p228_p8 }
  0x18   :  { %236 = shalt.err (!%p233_p10)
}
  0x19   :  { %s237_s6 = scalar_lea.vmem %s325_s15, 1024  ;;  %p242_p12 = scmp.lt.s32.totalorder %s325_s15, %s325_s15 }
  0x1a   :  { %p238_p11 = scmp.ne.s32.totalorder %s325_s15, %s237_s6  ;;  %p243_p13 = scmp.lt.s32.totalorder %s237_s6, %s237_s6 }
  0x1c   :  { %p244_p0 = por %p243_p13, %p242_p12 }
  0x1e   :  { %p245_p1 = pnand %p244_p0, %p238_p11 }
  0x20   :  { %248 = shalt.err (!%p245_p1)
}
  0x21   :  { %s301_s1 = smov 256   ;;  %s302_s7 = smov 16  }
  0x22   :  { %22 = dma.hbm_to_vmem [thread:$0]  %s396_s0, 1024, %s325_s15, [#allocation3], %s301_s1, %s301_s1, %s302_s7  }
  0x23   :  { %s303_s10 = smov [#allocation7]   ;;  %s249_s14 = scalar_lea.hbm %s398_s2, 32 }
  0x24   :  { %s39_s11 = sshll.u32 %s303_s10, 4  ;;  %p250_p2 = scmp.ne.s32.totalorder %s398_s2, %s249_s14  ;;  %s40_s11 = int_to_ptr.vmem [resolvable:$true] %s39_s11 }
  0x25   :  { %p253_p3 = scmp.lt.u32.totalorder %s249_s14, %s398_s2 }
  0x27   :  { %p255_p4 = pnand %p253_p3, %p250_p2 }
  0x29   :  { %258 = shalt.err (!%p255_p4)
}
  0x2a   :  { %s259_s20 = scalar_lea.vmem %s40_s11, 32  ;;  %p264_p6 = scmp.lt.s32.totalorder %s40_s11, %s40_s11 }
  0x2b   :  { %p260_p5 = scmp.ne.s32.totalorder %s40_s11, %s259_s20  ;;  %p265_p7 = scmp.lt.s32.totalorder %s259_s20, %s259_s20 }
  0x2d   :  { %p266_p8 = por %p265_p7, %p264_p6 }
  0x2f   :  { %p267_p9 = pnand %p266_p8, %p260_p5 }
  0x31   :  { %270 = shalt.err (!%p267_p9)
}
  0x32   :  { %42 = dma.hbm_to_vmem [thread:$0]  %s398_s2, 32, %s40_s11, [#allocation6]  }
  0x33   :  { %293 = dma.done.wait [#allocation3], 1024  }
  0x34   :  { %294 = vsyncadd [#allocation3], 4294966272 }
  0x35   :  { %295 = dma.done.wait [#allocation6], 64  }
  0x36   :  { %296 = vsyncadd [#allocation6], 4294967232  ;;  %v52_v0 = vld [vmem:[#allocation2] sm:$0xff]  ;;  %v53_v1 = vld [vmem:[#allocation2 + $0x8] sm:$0xff]  ;;  %v127_v42 = vlaneseq  ;;  %s304_s2 = smov [#allocation8]  }
  0x37   :  { %v56_v2 = vld [vmem:[#allocation2 + $0x20] sm:$0xff]  ;;  %v60_v3 = vadd.f32 %v53_v1, %v52_v0  ;;  %v57_v4 = vld [vmem:[#allocation2 + $0x28] sm:$0xff]  ;;  %v54_v5 = vld [vmem:[#allocation2 + $0x10] sm:$0xff]  ;;  %s178_s21 = sshll.u32 %s304_s2, 4  ;;  %s179_s21 = int_to_ptr.vmem [resolvable:$true] %s178_s21 }
  0x38   :  { %v55_v6 = vld [vmem:[#allocation2 + $0x18] sm:$0xff]  ;;  %v66_v7 = vadd.f32 %v57_v4, %v56_v2  ;;  %v58_v8 = vld [vmem:[#allocation2 + $0x30] sm:$0xff]  ;;  %v128_v48 = vshrl.u32 %v127_v42, 7  ;;  %v125_v55 = vld [vmem:[#allocation5] sm:$0x3]  ;;  %s271_s22 = scalar_lea.vmem %s179_s21, 1024  ;;  %p276_p11 = scmp.lt.s32.totalorder %s179_s21, %s179_s21 }
  0x39   :  { %v59_v9 = vld [vmem:[#allocation2 + $0x38] sm:$0xff]  ;;  %61 = vadd.xlane.f32.xlu0 %v60_v3  ;;  %v63_v10 = vadd.f32 %v55_v6, %v54_v5  ;;  %v145_v57 = vld [vmem:[#allocation7] sm:$0x3]  ;;  %p272_p10 = scmp.ne.s32.totalorder %s179_s21, %s271_s22  ;;  %p277_p12 = scmp.lt.s32.totalorder %s271_s22, %s271_s22 }
  0x3a   :  { %67 = vadd.xlane.f32.xlu1 %v66_v7  ;;  %v69_v11 = vadd.f32 %v59_v9, %v58_v8  ;;  %v129_v53 = vsub.s32 0, %v128_v48  ;;  %v133_v54 = vsub.s32 1, %v128_v48 }
  0x3b   :  { %p278_p13 = por %p277_p12, %p276_p11 }
  0x3c   :  { %v130_v58 = vrot.slane %v125_v55, %v129_v53  ;;  %v134_v59 = vrot.slane %v125_v55, %v133_v54  ;;  %v150_v61 = vrot.slane %v145_v57, %v129_v53  ;;  %v154_v62 = vrot.slane %v145_v57, %v133_v54 }
  0x3d   :  { %64 = vadd.xlane.f32.xlu0 %v63_v10  ;;  %p279_p0 = pnand %p278_p13, %p272_p10 }
  0x3e   :  { %70 = vadd.xlane.f32.xlu1 %v69_v11 }
  0xc6   :  { %v62_v12 = vpop.xlane.xlu0 %61 }
  0xc7   :  { %v73_v13 = vmul.f32 0.00390625, %v62_v12  ;;  %v68_v14 = vpop.xlane.xlu1 %67 }
  0xc8   :  { %v75_v15 = vmul.f32 0.00390625, %v68_v14 }
  0xc9   :  { %v77_v16 = vsub.f32 %v52_v0, %v73_v13  ;;  %v78_v17 = vsub.f32 %v53_v1, %v73_v13 }
  0xca   :  { %v371_v18 = vsub.f32 %v56_v2, %v75_v15  ;;  %v373_v19 = vsub.f32 %v57_v4, %v75_v15  ;;  %v65_v20 = vpop.xlane.xlu0 %64 }
  0xcb   :  { %v74_v21 = vmul.f32 0.00390625, %v65_v20  ;;  %v71_v22 = vpop.xlane.xlu1 %70  ;;  %v85_v23 = vmul.f32 %v77_v16, %v77_v16  ;;  %v86_v24 = vmul.f32 %v78_v17, %v78_v17 }
  0xcc   :  { %v76_v25 = vmul.f32 0.00390625, %v71_v22  ;;  %v89_v26 = vmul.f32 %v371_v18, %v371_v18  ;;  %v90_v27 = vmul.f32 %v373_v19, %v373_v19 }
  0xcd   :  { %v79_v28 = vsub.f32 %v54_v5, %v74_v21  ;;  %v80_v29 = vsub.f32 %v55_v6, %v74_v21  ;;  %v93_v30 = vadd.f32 %v86_v24, %v85_v23 }
  0xce   :  { %v83_v31 = vsub.f32 %v58_v8, %v76_v25  ;;  %v84_v32 = vsub.f32 %v59_v9, %v76_v25  ;;  %v99_v33 = vadd.f32 %v90_v27, %v89_v26 }
  0xcf   :  { %94 = vadd.xlane.f32.xlu0 %v93_v30  ;;  %v87_v34 = vmul.f32 %v79_v28, %v79_v28  ;;  %v88_v35 = vmul.f32 %v80_v29, %v80_v29 }
  0xd0   :  { %v91_v36 = vmul.f32 %v83_v31, %v83_v31  ;;  %v92_v37 = vmul.f32 %v84_v32, %v84_v32 }
  0xd1   :  { %v96_v38 = vadd.f32 %v88_v35, %v87_v34 }
  0xd2   :  { %v102_v39 = vadd.f32 %v92_v37, %v91_v36 }
  0xd3   :  { %100 = vadd.xlane.f32.xlu0 %v99_v33  ;;  %97 = vadd.xlane.f32.xlu1 %v96_v38 }
  0xd7   :  { %103 = vadd.xlane.f32.xlu1 %v102_v39 }
 0x15c   :  { %v95_v40 = vpop.xlane.xlu0 %94 }
 0x15d   :  { %v105_v41 = vmul.f32 0.00390625, %v95_v40 }
 0x15f   :  { %v109_v43 = vadd.f32 1e-05, %v105_v41 }
 0x160   :  { %v98_v44 = vpop.xlane.xlu1 %97  ;;  %v101_v45 = vpop.xlane.xlu0 %100 }
 0x161   :  { %197 = vrsqrt.f32 %v109_v43  ;;  %v106_v46 = vmul.f32 0.00390625, %v98_v44  ;;  %v107_v47 = vmul.f32 0.00390625, %v101_v45 }
 0x163   :  { %v110_v49 = vadd.f32 1e-05, %v106_v46  ;;  %v111_v50 = vadd.f32 1e-05, %v107_v47 }
 0x164   :  { %v104_v51 = vpop.xlane.xlu1 %103 }
 0x165   :  { %199 = vrsqrt.f32 %v110_v49  ;;  %v108_v52 = vmul.f32 0.00390625, %v104_v51 }
 0x166   :  { %201 = vrsqrt.f32 %v111_v50 }
 0x167   :  { %v112_v56 = vadd.f32 1e-05, %v108_v52 }
 0x169   :  { %203 = vrsqrt.f32 %v112_v56 }
 0x16b   :  { %v198_v60 = vpop.eup %197 }
 0x16c   :  { %v117_v63 = vmul.f32 %v198_v60, %v77_v16  ;;  %v118_v0 = vmul.f32 %v198_v60, %v78_v17 }
 0x16e   :  { %v137_v1 = vmul.f32 %v130_v58, %v117_v63  ;;  %v138_v2 = vmul.f32 %v134_v59, %v118_v0 }
 0x16f   :  { %v200_v3 = vpop.eup %199 }
 0x170   :  { %v202_v4 = vpop.eup %201  ;;  %v157_v5 = vadd.f32 %v150_v61, %v137_v1  ;;  %v158_v6 = vadd.f32 %v154_v62, %v138_v2  ;;  %v119_v7 = vmul.f32 %v200_v3, %v79_v28  ;;  %v120_v8 = vmul.f32 %v200_v3, %v80_v29 }
 0x171   :  { %v121_v9 = vmul.f32 %v202_v4, %v371_v18  ;;  %v122_v10 = vmul.f32 %v202_v4, %v373_v19 }
 0x172   :  { %165 = vst [vmem:[#allocation8] sm:$0xff] %v157_v5  ;;  %166 = vst [vmem:[#allocation8 + $0x8] sm:$0xff] %v158_v6  ;;  %v139_v11 = vmul.f32 %v130_v58, %v119_v7  ;;  %v140_v12 = vmul.f32 %v134_v59, %v120_v8 }
 0x173   :  { %v204_v13 = vpop.eup %203  ;;  %v141_v14 = vmul.f32 %v130_v58, %v121_v9  ;;  %v142_v15 = vmul.f32 %v134_v59, %v122_v10 }
 0x174   :  { %v159_v16 = vadd.f32 %v150_v61, %v139_v11  ;;  %v160_v17 = vadd.f32 %v154_v62, %v140_v12  ;;  %v123_v20 = vmul.f32 %v204_v13, %v83_v31  ;;  %v124_v21 = vmul.f32 %v204_v13, %v84_v32 }
 0x175   :  { %v161_v22 = vadd.f32 %v150_v61, %v141_v14  ;;  %v162_v23 = vadd.f32 %v154_v62, %v142_v15 }
 0x176   :  { %167 = vst [vmem:[#allocation8 + $0x10] sm:$0xff] %v159_v16  ;;  %168 = vst [vmem:[#allocation8 + $0x18] sm:$0xff] %v160_v17  ;;  %v143_v18 = vmul.f32 %v130_v58, %v123_v20  ;;  %v144_v24 = vmul.f32 %v134_v59, %v124_v21 }
 0x177   :  { %169 = vst [vmem:[#allocation8 + $0x20] sm:$0xff] %v161_v22  ;;  %170 = vst [vmem:[#allocation8 + $0x28] sm:$0xff] %v162_v23 }
 0x178   :  { %v163_v19 = vadd.f32 %v150_v61, %v143_v18  ;;  %v164_v25 = vadd.f32 %v154_v62, %v144_v24 }
 0x17a   :  { %171 = vst [vmem:[#allocation8 + $0x30] sm:$0xff] %v163_v19  ;;  %172 = vst [vmem:[#allocation8 + $0x38] sm:$0xff] %v164_v25 }
 0x17b   :  { %282 = shalt.err (!%p279_p0)
}
 0x17c   :  { %s283_s25 = scalar_lea.hbm %s399_s3, 1024 }
 0x17d   :  { %p284_p1 = scmp.ne.s32.totalorder %s399_s3, %s283_s25  ;;  %p287_p2 = scmp.lt.u32.totalorder %s283_s25, %s399_s3 }
 0x17f   :  { %p289_p3 = pnand %p287_p2, %p284_p1 }
 0x181   :  { %292 = shalt.err (!%p289_p3)
}
 0x182   :  { %184 = dma.vmem_to_hbm [thread:$0]  %s179_s21, 1024, %s399_s3, [#allocation4], %s301_s1, %s301_s1, %s302_s7  }
 0x183   :  { %297 = dma.done.wait [#allocation4], 1024  }
 0x184   :  { %298 = vsyncadd [#allocation4], 4294966272 }
 0x185   :  { %188 = vsyncpa [#allocation3], 1 }
 0x186   :  { %189 = vsyncpa [#allocation6], 1 }
 0x187   :  { %190 = vsyncpa [#allocation4], 1 }

// kernel: distributed_block_forward.5
= control target key start
LH: loop header
LB: loop body
LE: loop exit
PB: predicated region body
PF: predicated region fallthrough
CT: control target
= control target key end

     0   :  { %10 = vsyncpa [#allocation3], 0  ;;  %s1504_s0 = inlined_call_operand.hbm [shape: f32[2,32,144], index: 0, kind: input, shape index: {}]   ;;  %s1505_s1 = inlined_call_operand.hbm [shape: bf16[32,32], index: 1, kind: input, shape index: {}]   ;;  %s1506_s2 = inlined_call_operand.hbm [shape: f32[32,1], index: 2, kind: input, shape index: {}]   ;;  %s1507_s3 = inlined_call_operand.hbm [shape: bf16[32,32], index: 3, kind: input, shape index: {}]   ;;  %s1508_s4 = inlined_call_operand.hbm [shape: f32[32,1], index: 4, kind: input, shape index: {}]   ;;  %s1509_s5 = inlined_call_operand.hbm [shape: f32[2,32,144], index: 5, kind: output, shape index: {}]  }
   0x1   :  { %12 = vsyncpa [#allocation3 + $0x1], 0 }
   0x2   :  { %13 = vsyncpa [#allocation6], 0 }
   0x3   :  { %14 = vsyncpa [#allocation9], 0 }
   0x4   :  { %15 = vsyncpa [#allocation4], 0 }
   0x5   :  { %17 = vsyncpa [#allocation4 + $0x1], 0  ;;  %s1177_s18 = smov 0   ;;  %s1179_s19 = smov 0  }
   0x6   :  { %s1181_s20 = smov 0   ;;  %s1183_s21 = smov 0  }
   0x7   :  { %s1185_s22 = smov 0   ;;  %s1187_s23 = smov 0  }
   0x8 LB: > { %1516 = sst [smem:[#allocation16_spill]] %s1110_s18  ;;  %s739_s24 = sadd.s32 4294967295, %s1130_s23   ;;  %s1130_s23 = sphi %s1187_s23, %s23_s23   ;;  %s1126_s22 = sphi %s1185_s22, %s1539_s22   ;;  %s1122_s21 = sphi %s1183_s21, %s1538_s21   ;;  %s1118_s20 = sphi %s1181_s20, %s1537_s20   ;;  %s1114_s19 = sphi %s1179_s19, %s1536_s19   ;;  %s1110_s18 = sphi %s1177_s18, %s1535_s18  }
   0x9   : > { %s740_s25 = sadd.s32 4294967294, %s1130_s23   ;;  %p57_p0 = scmp.ne.s32.totalorder %s1114_s19, %s1110_s18 }
   0xa   : > { %p1211_p1 = scmp.eq.s32.totalorder %s739_s24, 0  ;;  %p1215_p2 = scmp.eq.s32.totalorder %s739_s24, 1 }
   0xb   : > { %p173_p3 = scmp.eq.s32.totalorder %s740_s25, 1  ;;  %p741_p5 = scmp.ge.s32.totalorder %s1130_s23, 1 }
   0xc   : > { %s1517_s26 = scalar_select %p1211_p1, 1, 0 }
   0xd   : > { %s1518_s27 = scalar_select %p1215_p2, 1, 0 }
   0xe   : > { %p1221_p4 = por %p1211_p1, %p57_p0  ;;  %p1226_p6 = por %p173_p3, %p57_p0 }
   0xf   : > { %p180_p7 = scmp.lt.s32.totalorder %s1130_s23, 3  ;;  %s1132_s6 = smov [#allocation5]  }
  0x10   : > { %s1519_s28 = scalar_select %p1221_p4, 1, 0 }
  0x11   : > { %s1520_s29 = scalar_select %p1226_p6, 1, 0 }
  0x12   : > { %p1231_p8 = pnand %p741_p5, %p180_p7  ;;  %s192_s7 = sshll.u32 %s1132_s6, 4  ;;  %s1235_s7 = int_to_ptr.vmem [resolvable:$true] %s192_s7 }
  0x13   : > { %1521 = sst [smem:[#allocation17_spill]] %s1520_s29  ;;  %s1133_s9 = smov [#allocation8]  }
  0x14   : > { %s1522_s30 = scalar_select %p1231_p8, 1, 0 }
  0x15   : > { %p800_p9 = pneg %p1231_p8  ;;  %s218_s10 = sshll.u32 %s1133_s9, 4  ;;  %s1246_s10 = int_to_ptr.vmem [resolvable:$true] %s218_s10 }
  0x16   : > { %s1134_s11 = smov [#allocation7]   ;;  %s898_s15 = scalar_lea.hbm %s1505_s1, 256 }
  0x17   : > { %p1242_p11 = pnand %p800_p9, %p1211_p1  ;;  %s1248_s12 = sshll.u32 %s1134_s11, 4  ;;  %s206_s12 = int_to_ptr.vmem [resolvable:$true] %s1248_s12 }
  0x18   : > { %p899_p12 = scmp.ne.s32.totalorder %s1505_s1, %s898_s15  ;;  %p905_p5 = scmp.lt.u32.totalorder %s898_s15, %s1505_s1 }
  0x19   : > { %p1258_p13 = pneg %p1242_p11 }
  0x1b   : > { %p901_p0 = pnand %p1258_p13, %p899_p12 }
  0x1d   : > { %p902_p3 = pneg %p901_p0 }
  0x1f   : > { %p907_p7 = pnand %p905_p5, %p902_p3 }
  0x21   : > { %910 = shalt.err (!%p907_p7)
}
  0x22   : > { %s911_s9 = scalar_lea.vmem %s1235_s7, 256  ;;  %p919_p1 = scmp.lt.s32.totalorder %s1235_s7, %s1235_s7 }
  0x23   : > { %p912_p9 = scmp.ne.s32.totalorder %s1235_s7, %s911_s9  ;;  %p920_p4 = scmp.lt.s32.totalorder %s911_s9, %s911_s9 }
  0x25   : > { %p914_p10 = pnand %p912_p9, %p1258_p13  ;;  %p921_p12 = por %p920_p4, %p919_p1 }
  0x27   : > { %p915_p6 = pneg %p914_p10 }
  0x29   : > { %p922_p0 = pnand %p921_p12, %p915_p6 }
  0x2b   : > { %925 = shalt.err (!%p922_p0)
}
  0x2c   : > { %s1135_s11 = smov 64   ;;  %s1136_s13 = smov 4  }
  0x2d   : > { %803 = dma.hbm_to_vmem [thread:$0]  (!%p1242_p11), %s1505_s1, 256, %s1235_s7, [#allocation6], %s1135_s11, %s1135_s11, %s1136_s13  }
  0x2e   : > { %s926_s25 = scalar_lea.hbm %s1507_s3, 256 }
  0x2f   : > { %p927_p1 = scmp.ne.s32.totalorder %s1507_s3, %s926_s25  ;;  %p933_p10 = scmp.lt.u32.totalorder %s926_s25, %s1507_s3 }
  0x31   : > { %p929_p4 = pnand %p927_p1, %p1258_p13 }
  0x33   : > { %p930_p6 = pneg %p929_p4 }
  0x35   : > { %p935_p3 = pnand %p933_p10, %p930_p6 }
  0x37   : > { %938 = shalt.err (!%p935_p3)
}
  0x38   : > { %s939_s7 = scalar_lea.vmem %s1246_s10, 256  ;;  %p947_p12 = scmp.lt.s32.totalorder %s1246_s10, %s1246_s10 }
  0x39   : > { %p940_p5 = scmp.ne.s32.totalorder %s1246_s10, %s939_s7  ;;  %p948_p0 = scmp.lt.s32.totalorder %s939_s7, %s939_s7 }
  0x3b   : > { %p942_p7 = pnand %p940_p5, %p1258_p13  ;;  %p949_p1 = por %p948_p0, %p947_p12 }
  0x3d   : > { %p943_p9 = pneg %p942_p7 }
  0x3f   : > { %p950_p4 = pnand %p949_p1, %p943_p9 }
  0x41   : > { %953 = shalt.err (!%p950_p4)
}
  0x42   : > { %809 = dma.hbm_to_vmem [thread:$0]  (!%p1242_p11), %s1507_s3, 256, %s1246_s10, [#allocation9], %s1135_s11, %s1135_s11, %s1136_s13  }
  0x43   : > { %s954_s16 = scalar_lea.hbm %s1506_s2, 512 }
  0x44   : > { %p955_p6 = scmp.ne.s32.totalorder %s1506_s2, %s954_s16  ;;  %p961_p5 = scmp.lt.u32.totalorder %s954_s16, %s1506_s2 }
  0x46   : > { %p957_p10 = pnand %p955_p6, %p1258_p13 }
  0x48   : > { %p958_p3 = pneg %p957_p10 }
  0x4a   : > { %p963_p7 = pnand %p961_p5, %p958_p3 }
  0x4c   : > { %966 = shalt.err (!%p963_p7)
}
  0x4d   : > { %s967_s7 = scalar_lea.vmem %s206_s12, 512  ;;  %p975_p1 = scmp.lt.s32.totalorder %s206_s12, %s206_s12 }
  0x4e   : > { %p968_p9 = scmp.ne.s32.totalorder %s206_s12, %s967_s7  ;;  %p976_p4 = scmp.lt.s32.totalorder %s967_s7, %s967_s7 }
  0x50   : > { %p970_p12 = pnand %p968_p9, %p1258_p13  ;;  %p977_p8 = por %p976_p4, %p975_p1 }
  0x52   : > { %p971_p0 = pneg %p970_p12 }
  0x54   : > { %p978_p2 = pnand %p977_p8, %p971_p0 }
  0x56   : > { %981 = shalt.err (!%p978_p2)
}
  0x57   : > { %s1137_s10 = smov 128   ;;  %s1138_s11 = smov 8  }
  0x58   : > { %806 = dma.hbm_to_vmem [thread:$0]  (!%p1242_p11), %s1506_s2, 512, %s206_s12, [#allocation6], %s1137_s10, %s1137_s10, %s1138_s11  }
  0x59   : > { %s1139_s29 = smov [#allocation10]   ;;  %s982_s17 = scalar_lea.hbm %s1508_s4, 512 }
  0x5a   : > { %s231_s14 = sshll.u32 %s1139_s29, 4  ;;  %p983_p2 = scmp.ne.s32.totalorder %s1508_s4, %s982_s17  ;;  %s232_s14 = int_to_ptr.vmem [resolvable:$true] %s231_s14 }
  0x5b   : > { %p989_p10 = scmp.lt.u32.totalorder %s982_s17, %s1508_s4 }
  0x5c   : > { %p985_p8 = pnand %p983_p2, %p1258_p13 }
  0x5e   : > { %p986_p6 = pneg %p985_p8 }
  0x60   : > { %p991_p3 = pnand %p989_p10, %p986_p6 }
  0x62   : > { %994 = shalt.err (!%p991_p3)
}
  0x63   : > { %s995_s12 = scalar_lea.vmem %s232_s14, 512  ;;  %p1003_p12 = scmp.lt.s32.totalorder %s232_s14, %s232_s14 }
  0x64   : > { %p996_p5 = scmp.ne.s32.totalorder %s232_s14, %s995_s12  ;;  %p1004_p0 = scmp.lt.s32.totalorder %s995_s12, %s995_s12 }
  0x66   : > { %p998_p7 = pnand %p996_p5, %p1258_p13  ;;  %p1005_p1 = por %p1004_p0, %p1003_p12 }
  0x68   : > { %p999_p9 = pneg %p998_p7 }
  0x6a   : > { %p1006_p4 = pnand %p1005_p1, %p999_p9 }
  0x6c   : > { %1009 = shalt.err (!%p1006_p4)
}
  0x6d   : > { %812 = dma.hbm_to_vmem [thread:$0]  (!%p1242_p11), %s1508_s4, 512, %s232_s14, [#allocation9], %s1137_s10, %s1137_s10, %s1138_s11  }
  0x6e   : > { %s35_s24 = sadd.s32 1, %s1126_s22  ;;  %s44_s29 = sadd.s32 1, %s1118_s20 }
  0x6f   : > { %p37_p13 = scmp.ge.s32.totalorder %s35_s24, 2  ;;  %p51_p2 = scmp.ne.s32.totalorder %s1118_s20, %s1114_s19 }
  0x70   : > { %p52_p8 = scmp.eq.s32.totalorder %s1130_s23, 0  ;;  %p825_p6 = scmp.lt.s32.totalorder %s1130_s23, 2 }
  0x71   : > { %s1541_s24 = smov (%p37_p13, %s35_s24), 0  ;;  %p1525_p3 = scmp.ne.s32.totalorder %s1518_s27, 0 }
  0x72   : > { %p53_p10 = por %p52_p8, %p51_p2  ;;  %s39_s15 = ssub.s32 %s1126_s22, %s1541_s24 }
  0x73   : > { %p1349_p5 = por %p1525_p3, %p51_p2  ;;  %s245_s16 = sand.u32 1, %s1118_s20  }
  0x74   : > { %p42_p7 = scmp.eq.s32.totalorder %s39_s15, 0  ;;  %s747_s10 = sshll.u32 %s245_s16, 6 }
  0x75   : > { %s778_s11 = sshll.u32 %s1126_s22, 10  ;;  %s249_s27 = scalar_lea.vmem [#allocation2], %s747_s10 }
  0x76   : > { %s1358_s14 = scalar_select %p42_p7, %s1118_s20, %s44_s29  }
  0x77   : > { %s1363_s6 = scalar_lea.hbm %s1504_s0, %s778_s11  ;;  %s258_s9 = sshll.u32 %s249_s27, 4  ;;  %s1371_s9 = int_to_ptr.vmem [resolvable:$true] %s258_s9 }
  0x78   : > { %p1367_p11 = pnand %p825_p6, %p53_p10  ;;  %s1373_s12 = scalar_lea.sflag [#allocation3], %s245_s16 }
  0x79   : > { %s1010_s13 = scalar_lea.hbm %s1363_s6, 1024  ;;  %s1015_s15 = scalar_lea.hbm %s1504_s0, 2048 }
  0x7a   : > { %p1011_p9 = scmp.ne.s32.totalorder %s1363_s6, %s1010_s13  ;;  %p1012_p12 = pneg %p1367_p11 }
  0x7b   : > { %p1016_p4 = scmp.lt.u32.totalorder %s1363_s6, %s1504_s0  ;;  %p1017_p13 = scmp.lt.u32.totalorder %s1015_s15, %s1010_s13 }
  0x7c   : > { %p1013_p0 = pnand %p1012_p12, %p1011_p9  ;;  %p1019_p8 = scmp.lt.u32.totalorder %s1010_s13, %s1363_s6 }
  0x7d   : > { %p1018_p2 = por %p1017_p13, %p1016_p4 }
  0x7e   : > { %p1014_p1 = pneg %p1013_p0 }
  0x7f   : > { %p1020_p6 = por %p1019_p8, %p1018_p2 }
  0x81   : > { %p1021_p10 = pnand %p1020_p6, %p1014_p1 }
  0x83   : > { %1024 = shalt.err (!%p1021_p10)
}
  0x84   : > { %s1025_s16 = scalar_lea.vmem %s1371_s9, 1024  ;;  %s1140_s17 = smov [#allocation2]  }
  0x85   : > { %p1026_p3 = scmp.ne.s32.totalorder %s1371_s9, %s1025_s16  ;;  %s1030_s25 = sshll.u32 %s1140_s17, 4  ;;  %s1031_s25 = int_to_ptr.vmem [resolvable:$false] %s1030_s25 }
  0x86   : > { %s1032_s27 = scalar_lea.vmem %s1031_s25, 2048  ;;  %p1033_p0 = scmp.lt.s32.totalorder %s1371_s9, %s1031_s25 }
  0x87   : > { %p1028_p7 = pnand %p1026_p3, %p1012_p12  ;;  %p1034_p4 = scmp.lt.s32.totalorder %s1032_s27, %s1025_s16 }
  0x89   : > { %p1029_p9 = pneg %p1028_p7  ;;  %p1035_p13 = por %p1034_p4, %p1033_p0 }
  0x8b   : > { %p1036_p2 = pnand %p1035_p13, %p1029_p9 }
  0x8d   : > { %1039 = shalt.err (!%p1036_p2)
}
  0x8e   : > { %s1141_s13 = smov 256   ;;  %s1142_s18 = smov 16  }
  0x8f   : > { %816 = dma.hbm_to_vmem [thread:$0]  (!%p1367_p11), %s1363_s6, 1024, %s1371_s9, %s1373_s12, %s1141_s13, %s1141_s13, %s1142_s18  }
  0x90   : > { %p1528_p12 = scmp.ne.s32.totalorder %s1522_s30, 0 }
  0x91   : > { %s1404_s29 = sand.u32 (!%p1528_p12), 1, %s1114_s19   ;;  %p1529_p1 = scmp.ne.s32.totalorder (!%p1528_p12), %s1519_s28, 0 }
  0x92   : > { %270 = sbr.rel (%p1528_p12) target bundleno = 650 (0x28a), region = 40  ;;  %s751_s15 = sshll.u32 (!%p1528_p12), %s1404_s29, 6 }
  0x93   : > { %s273_s10 = scalar_lea.sflag (!%p1528_p12), [#allocation3], %s1404_s29  ;;  %s276_s11 = scalar_lea.vmem (!%p1528_p12), [#allocation2], %s751_s15 }
  0x99   : > { %1093 = dma.done.wait (%p1529_p1), %s273_s10, 1024  }
  0x9a   : > { %1095 = vsyncadd (%p1529_p1), %s273_s10, 4294966272  ;;  %p1530_p11 = scmp.ne.s32.totalorder %s1517_s26, 0 }
  0x9c   : > { %1097 = dma.done.wait (%p1530_p11), [#allocation6], 768  }
  0x9d   : > { %1099 = vsyncadd (%p1530_p11), [#allocation6], 4294966528 }
  0x9e   : > { %1101 = dma.done.wait (%p1530_p11), [#allocation9], 768  }
  0x9f   : > { %1103 = vsyncadd (%p1530_p11), [#allocation9], 4294966528  ;;  %v1143_v0 = vmov 0   ;;  %v323_v1 = vld [vmem:[%s276_s11 + $0x8] sm:$0xff]  ;;  %v325_v2 = vld [vmem:[%s276_s11 + $0x18] sm:$0xff]  ;;  %vm372_vm0 = vcmask 261120  }
  0xa0   : > { %411 = vmatprep.mubr.bf16.mxu0 %v1143_v0  ;;  %892 = vset.pattern.permute.xlu0 %v1143_v0  ;;  %v322_v3 = vld [vmem:[%s276_s11] sm:$0xff]  ;;  %v331_v4 = vpack.c.bf16 %v325_v2, %v323_v1  ;;  %v324_v5 = vld [vmem:[%s276_s11 + $0x10] sm:$0xff]  ;;  %v327_v6 = vld [vmem:[%s276_s11 + $0x28] sm:$0xff]  ;;  %vm590_vm2 = vcmask 130048   ;;  %s1434_s26 = scalar_lea.vmem [#allocation11], %s751_s15  ;;  %s779_s28 = sshll.u32 %s1122_s21, 10 }
  0xa1   : > { %893 = vset.pattern.permute.xlu1 %v1143_v0  ;;  %520 = vmatprep.mubr.bf16.mxu1 %v1143_v0  ;;  %v329_v7 = vld [vmem:[%s276_s11 + $0x38] sm:$0xff]  ;;  %v330_v8 = vpack.c.bf16 %v324_v5, %v322_v3  ;;  %v326_v10 = vld [vmem:[%s276_s11 + $0x20] sm:$0xff]  ;;  %v328_v11 = vld [vmem:[%s276_s11 + $0x30] sm:$0xff]  ;;  %s614_s30 = sshll.u32 %s1434_s26, 4  ;;  %s1450_s9 = scalar_lea.hbm %s1509_s5, %s779_s28  ;;  %s1452_s30 = int_to_ptr.vmem [resolvable:$true] %s614_s30 }
  0xa2   : > { %v333_v9 = vpack.c.bf16 %v329_v7, %v327_v6  ;;  %379 = vmatprep.subr.bf16.mxu0 %v331_v4  ;;  %v332_v12 = vpack.c.bf16 %v328_v11, %v326_v10  ;;  %v338_v13 = vld [vmem:[#allocation7] sm:$0xff]  ;;  %v340_v14 = vld [vmem:[#allocation7 + $0x10] sm:$0xff]  ;;  %v339_v16 = vld [vmem:[#allocation7 + $0x8] sm:$0xff]  ;;  %s599_s7 = scalar_lea.sflag [#allocation4], %s1404_s29  ;;  %s1040_s12 = scalar_lea.vmem %s1452_s30, 1024 }
  0xa3   : > { %380 = vmatpush1.bf16.msra.mxu0 %v330_v8  ;;  %344 = vperm.xlu0 %892, %v338_v13   ;;  %v894_v15 = vld [vmem:[#allocation5] sm:$0xff]   ;;  %v341_v17 = vld [vmem:[#allocation7 + $0x18] sm:$0xff]  ;;  %v450_v20 = vld [vmem:[#allocation10 + $0x10] sm:$0xff]  ;;  %p1041_p8 = scmp.ne.s32.totalorder %s1452_s30, %s1040_s12  ;;  %s1144_s16 = smov [#allocation11]  }
  0xa4   : > { %381 = vmatprep.subr.bf16.mxu0 %v333_v9  ;;  %354 = vperm.xlu1 %893, %v340_v14   ;;  %v448_v18 = vld [vmem:[#allocation10] sm:$0xff]  ;;  %v449_v19 = vld [vmem:[#allocation10 + $0x8] sm:$0xff]  ;;  %v451_v22 = vld [vmem:[#allocation10 + $0x18] sm:$0xff]  ;;  %s1044_s17 = sshll.u32 %s1144_s16, 4  ;;  %s1045_s17 = int_to_ptr.vmem [resolvable:$false] %s1044_s17 }
  0xa5   : > { %v895_v21 = vld [vmem:[#allocation5 + $0x8] sm:$0xff]   ;;  %v896_v55 = vld [vmem:[#allocation8] sm:$0xff]   ;;  %v897_v56 = vld [vmem:[#allocation8 + $0x8] sm:$0xff]   ;;  %p1042_p6 = pnand %p1041_p8, %p1349_p5  ;;  %s1046_s25 = scalar_lea.vmem %s1045_s17, 2048 }
  0xa6   : > { %p1047_p3 = scmp.lt.s32.totalorder %s1452_s30, %s1045_s17  ;;  %p1048_p7 = scmp.lt.s32.totalorder %s1046_s25, %s1040_s12 }
  0xa7   : > { %382 = vmatpush1.bf16.msra.mxu0 %v332_v12  ;;  %349 = vperm.xlu0 %892, %v339_v16   ;;  %p1043_p10 = pneg %p1042_p6 }
  0xa8   : > { %359 = vperm.xlu1 %893, %v341_v17   ;;  %p1049_p9 = por %p1048_p7, %p1047_p3 }
  0xaa   : > { %759 = vmatmul.mubr.msk.bf16.vlgmr.msra.gmra.mrb[0].mxu0 %vm372_vm0, %v894_v15  ;;  %p1050_p0 = pnand %p1049_p9, %p1043_p10 }
  0xab   : > { %421 = vmatprep.mubr.bf16.mxu0 %v1143_v0  ;;  %454 = vperm.xlu0 %892, %v448_v18  }
  0xac   : > { %459 = vperm.xlu1 %893, %v449_v19  }
  0xaf   : > { %464 = vperm.xlu0 %892, %v450_v20  }
  0xb0   : > { %469 = vperm.xlu1 %893, %v451_v22  }
  0xb2   : > { %760 = vmatmul.mubr.msk.bf16.gmra.mrb[4].mxu0 %vm372_vm0, %v895_v21 }
 0x122   : > { %v345_v23 = vpop.permute.xlu0 %344 }
 0x123   : > { %v355_v32 = vpop.permute.xlu1 %354 }
 0x126   : > { %v350_v27 = vpop.permute.xlu0 %349 }
 0x127   : > { %v360_v43 = vpop.permute.xlu1 %359 }
 0x12a   : > { %v455_v57 = vpop.permute.xlu0 %454 }
 0x12b   : > { %v460_v61 = vpop.permute.xlu1 %459 }
 0x12e   : > { %v465_v12 = vpop.permute.xlu0 %464 }
 0x12f   : > { %v470_v19 = vpop.permute.xlu1 %469 }
 0x17d   : > { %v413_v24 = vpop.f32.mrb[0].mxu0 }
 0x17e   : > { %v414_v25 = vadd.f32 %v413_v24, %v345_v23  ;;  %v415_v26 = vpop.f32.mrb[1].mxu0 }
 0x17f   : > { %v416_v28 = vadd.f32 %v415_v26, %v345_v23  ;;  %v417_v29 = vpop.f32.mrb[2].mxu0 }
 0x180   : > { %v418_v30 = vadd.f32 %v417_v29, %v350_v27  ;;  %v419_v31 = vpop.f32.mrb[3].mxu0  ;;  %v432_v34 = vmax.f32 %v414_v25, 0.0 }
 0x181   : > { %v420_v33 = vadd.f32 %v419_v31, %v350_v27  ;;  %v433_v36 = vmax.f32 %v416_v28, 0.0 }
 0x182   : > { %v434_v35 = vmax.f32 %v418_v30, 0.0 }
 0x183   : > { %v435_v37 = vmax.f32 %v420_v33, 0.0 }
 0x184   : > { %v444_v38 = vpack.c.bf16 %v434_v35, %v432_v34 }
 0x185   : > { %v423_v39 = vpop.f32.mrb[4].mxu0  ;;  %v445_v40 = vpack.c.bf16 %v435_v37, %v433_v36 }
 0x186   : > { %v424_v41 = vadd.f32 %v423_v39, %v355_v32  ;;  %v425_v42 = vpop.f32.mrb[5].mxu0 }
 0x187   : > { %v426_v44 = vadd.f32 %v425_v42, %v355_v32  ;;  %v427_v45 = vpop.f32.mrb[6].mxu0  ;;  %488 = vmatprep.subr.bf16.mxu1 %v445_v40 }
 0x188   : > { %v428_v46 = vadd.f32 %v427_v45, %v360_v43  ;;  %v429_v47 = vpop.f32.mrb[7].mxu0  ;;  %489 = vmatpush1.bf16.msra.mxu1 %v444_v38  ;;  %v436_v49 = vmax.f32 %v424_v41, 0.0 }
 0x189   : > { %v430_v48 = vadd.f32 %v429_v47, %v360_v43  ;;  %v437_v51 = vmax.f32 %v426_v44, 0.0 }
 0x18a   : > { %v438_v50 = vmax.f32 %v428_v46, 0.0 }
 0x18b   : > { %v439_v52 = vmax.f32 %v430_v48, 0.0 }
 0x18c   : > { %v446_v53 = vpack.c.bf16 %v438_v50, %v436_v49 }
 0x18d   : > { %v447_v54 = vpack.c.bf16 %v439_v52, %v437_v51 }
 0x18f   : > { %490 = vmatprep.subr.bf16.mxu1 %v447_v54 }
 0x190   : > { %491 = vmatpush1.bf16.msra.mxu1 %v446_v53 }
 0x193   : > { %763 = vmatmul.mubr.msk.bf16.vlgmr.msra.gmra.mrb[0].mxu1 %vm372_vm0, %v896_v55 }
 0x194   : > { %530 = vmatprep.mubr.bf16.mxu1 %v1143_v0 }
 0x19b   : > { %764 = vmatmul.mubr.msk.bf16.gmra.mrb[4].mxu1 %vm372_vm0, %v897_v56 }
 0x266   : > { %v522_v58 = vpop.f32.mrb[0].mxu1 }
 0x267   : > { %v523_v59 = vadd.f32 %v522_v58, %v455_v57  ;;  %v524_v60 = vpop.f32.mrb[1].mxu1 }
 0x268   : > { %v525_v62 = vadd.f32 %v524_v60, %v455_v57  ;;  %v526_v63 = vpop.f32.mrb[2].mxu1 }
 0x269   : > { %v765_v1 = vadd.f32 -0.01, %v523_v59  ;;  %vm557_vm1 = vcmp.lt.f32.partialorder %v523_v59, -0.01  ;;  %v527_v2 = vadd.f32 %v526_v63, %v460_v61  ;;  %vm541_vm3 = vcmp.gt.f32.partialorder %v523_v59, 0.01 }
 0x26a   : > { %v565_v3 = vadd.f32 0.01, %v523_v59  ;;  %v766_v4 = vadd.f32 -0.01, %v525_v62  ;;  %vm542_vm4 = vcmp.gt.f32.partialorder %v525_v62, 0.01 }
 0x26b   : > { %vm558_vm5 = vcmp.lt.f32.partialorder %v525_v62, -0.01  ;;  %v566_v0 = vadd.f32 0.01, %v525_v62  ;;  %v767_v6 = vadd.f32 -0.01, %v527_v2 }
 0x26c   : > { %v573_v5 = vsel %vm557_vm1, %v565_v3, 0.0  ;;  %vm559_vm6 = vcmp.lt.f32.partialorder %v527_v2, -0.01  ;;  %v528_v7 = vpop.f32.mrb[3].mxu1  ;;  %v567_v10 = vadd.f32 0.01, %v527_v2 }
 0x26d   : > { %v581_v8 = vsel %vm541_vm3, %v765_v1, %v573_v5  ;;  %v574_v9 = vsel %vm558_vm5, %v566_v0, 0.0  ;;  %v529_v11 = vadd.f32 %v528_v7, %v460_v61  ;;  %vm543_vm7 = vcmp.gt.f32.partialorder %v527_v2, 0.01 }
 0x26e   : > { %589 = vst [vmem:[%s1434_s26] sm:$0xff] %v581_v8  ;;  %v582_v13 = vsel %vm542_vm4, %v766_v4, %v574_v9  ;;  %v532_v14 = vpop.f32.mrb[4].mxu1  ;;  %v575_v15 = vsel %vm559_vm6, %v567_v10, 0.0 }
 0x26f   : > { %591 = vst.msk [vmem:[%s1434_s26 + $0x8] sm:$0xff] %vm590_vm2, %v582_v13  ;;  %v768_v16 = vadd.f32 -0.01, %v529_v11  ;;  %v533_v17 = vadd.f32 %v532_v14, %v465_v12  ;;  %v534_v18 = vpop.f32.mrb[5].mxu1  ;;  %v583_v20 = vsel %vm543_vm7, %v767_v6, %v575_v15  ;;  %vm560_vm8 = vcmp.lt.f32.partialorder %v529_v11, -0.01 }
 0x270   : > { %v568_v21 = vadd.f32 0.01, %v529_v11  ;;  %v535_v22 = vadd.f32 %v534_v18, %v465_v12  ;;  %v536_v23 = vpop.f32.mrb[6].mxu1  ;;  %592 = vst [vmem:[%s1434_s26 + $0x10] sm:$0xff] %v583_v20  ;;  %vm544_vm9 = vcmp.gt.f32.partialorder %v529_v11, 0.01 }
 0x271   : > { %v769_v24 = vadd.f32 -0.01, %v533_v17  ;;  %vm561_vm10 = vcmp.lt.f32.partialorder %v533_v17, -0.01  ;;  %v537_v25 = vadd.f32 %v536_v23, %v470_v19  ;;  %vm545_vm11 = vcmp.gt.f32.partialorder %v533_v17, 0.01 }
 0x272   : > { %v576_v26 = vsel %vm560_vm8, %v568_v21, 0.0  ;;  %v569_v27 = vadd.f32 0.01, %v533_v17  ;;  %v538_v28 = vpop.f32.mrb[7].mxu1  ;;  %v770_v30 = vadd.f32 -0.01, %v535_v22 }
 0x273   : > { %v584_v29 = vsel %vm544_vm9, %v768_v16, %v576_v26  ;;  %vm562_vm12 = vcmp.lt.f32.partialorder %v535_v22, -0.01  ;;  %v570_v31 = vadd.f32 0.01, %v535_v22  ;;  %vm546_vm13 = vcmp.gt.f32.partialorder %v535_v22, 0.01 }
 0x274   : > { %593 = vst.msk [vmem:[%s1434_s26 + $0x18] sm:$0xff] %vm590_vm2, %v584_v29  ;;  %v577_v32 = vsel %vm561_vm10, %v569_v27, 0.0  ;;  %v771_v33 = vadd.f32 -0.01, %v537_v25  ;;  %v539_v34 = vadd.f32 %v538_v28, %v470_v19  ;;  %vm563_vm14 = vcmp.lt.f32.partialorder %v537_v25, -0.01 }
 0x275   : > { %v585_v35 = vsel %vm545_vm11, %v769_v24, %v577_v32  ;;  %v578_v36 = vsel %vm562_vm12, %v570_v31, 0.0  ;;  %v571_v37 = vadd.f32 0.01, %v537_v25  ;;  %vm547_vm0 = vcmp.gt.f32.partialorder %v537_v25, 0.01 }
 0x276   : > { %594 = vst [vmem:[%s1434_s26 + $0x20] sm:$0xff] %v585_v35  ;;  %v586_v38 = vsel %vm546_vm13, %v770_v30, %v578_v36  ;;  %v772_v39 = vadd.f32 -0.01, %v539_v34  ;;  %vm564_vm15 = vcmp.lt.f32.partialorder %v539_v34, -0.01 }
 0x277   : > { %595 = vst.msk [vmem:[%s1434_s26 + $0x28] sm:$0xff] %vm590_vm2, %v586_v38  ;;  %v579_v40 = vsel %vm563_vm14, %v571_v37, 0.0  ;;  %v572_v41 = vadd.f32 0.01, %v539_v34  ;;  %vm548_vm1 = vcmp.gt.f32.partialorder %v539_v34, 0.01 }
 0x278   : > { %v587_v42 = vsel %vm547_vm0, %v771_v33, %v579_v40 }
 0x279   : > { %596 = vst [vmem:[%s1434_s26 + $0x30] sm:$0xff] %v587_v42  ;;  %v580_v43 = vsel %vm564_vm15, %v572_v41, 0.0 }
 0x27a   : > { %v588_v44 = vsel %vm548_vm1, %v772_v39, %v580_v43 }
 0x27b   : > { %597 = vst.msk [vmem:[%s1434_s26 + $0x38] sm:$0xff] %vm590_vm2, %v588_v44 }
 0x27c   : > { %1053 = shalt.err (!%p1050_p0)
}
 0x27d   : > { %s1054_s27 = scalar_lea.hbm %s1450_s9, 1024  ;;  %s1058_s15 = scalar_lea.hbm %s1509_s5, 2048 }
 0x27e   : > { %p1055_p4 = scmp.ne.s32.totalorder %s1450_s9, %s1054_s27  ;;  %p1059_p12 = scmp.lt.u32.totalorder %s1450_s9, %s1509_s5 }
 0x27f   : > { %p1060_p1 = scmp.lt.u32.totalorder %s1058_s15, %s1054_s27  ;;  %p1062_p8 = scmp.lt.u32.totalorder %s1054_s27, %s1450_s9 }
 0x280   : > { %p1056_p13 = pnand %p1055_p4, %p1349_p5 }
 0x281   : > { %p1061_p11 = por %p1060_p1, %p1059_p12 }
 0x282   : > { %p1057_p2 = pneg %p1056_p13 }
 0x283   : > { %p1063_p6 = por %p1062_p8, %p1061_p11 }
 0x285   : > { %p1064_p10 = pnand %p1063_p6, %p1057_p2 }
 0x287   : > { %1067 = shalt.err (!%p1064_p10)
}
 0x288   : > { %s1145_s26 = smov 256   ;;  %s1146_s28 = smov 16  }
 0x289   : > { %798 = dma.vmem_to_hbm [thread:$0]  (%p1349_p5), %s1452_s30, 1024, %s1450_s9, %s599_s7, %s1145_s26, %s1145_s26, %s1146_s28  }
 0x28a PF: > { %s1531_s21 = sld [smem:[#allocation16_spill]]  ;;  %s1532_s6 = sld [smem:[#allocation17_spill]] }
 0x28b   : > { %p1534_p7 = scmp.ge.s32.totalorder %s1130_s23, 2 }
 0x290   : > { %s629_s12 = sand.u32 1, %s1531_s21   ;;  %p1533_p3 = scmp.ne.s32.totalorder %s1532_s6, 0 }
 0x291   : > { %s630_s16 = scalar_lea.sflag [#allocation4], %s629_s12 }
 0x292   : > { %p818_p9 = pnand %p1534_p7, %p1533_p3 }
 0x294   : > { %1105 = dma.done.wait (!%p818_p9), %s630_s16, 1024  }
 0x295   : > { %1107 = vsyncadd (!%p818_p9), %s630_s16, 4294966272  ;;  %s23_s23 = sadd.s32 1, %s1130_s23   ;;  %s1535_s18 = smov %s1114_s19 }
 0x296   : > { %p20_p0 = scmp.ge.s32.totalorder %s23_s23, 4   ;;  %s1536_s19 = smov %s1118_s20 }
 0x297   : > { %s1537_s20 = smov %s1358_s14  ;;  %s1538_s21 = smov %s1126_s22 }
 0x298   : > { %s1539_s22 = smov %s1541_s24  ;;  %22 = sbr.rel (!%p20_p0) target bundleno = 8 (0x8), region = 101 }
 0x29f   :  { %635 = vsyncpa [#allocation3], 1 }
 0x2a0   :  { %637 = vsyncpa [#allocation3 + $0x1], 1 }
 0x2a1   :  { %638 = vsyncpa [#allocation6], 1 }
 0x2a2   :  { %639 = vsyncpa [#allocation9], 1 }
 0x2a3   :  { %640 = vsyncpa [#allocation4], 1 }
 0x2a4   :  { %642 = vsyncpa [#allocation4 + $0x1], 1 }

// kernel: reverse.1
= control target key start
LH: loop header
LB: loop body
LE: loop exit
PB: predicated region body
PF: predicated region fallthrough
CT: control target
= control target key end

     0   :  { %s344_s0 = inlined_call_operand.vmem [shape: f32[2,16,16,7], index: 0, kind: input, shape index: {}]   ;;  %s345_s1 = inlined_call_operand.vmem [shape: f32[2,16,16,7], index: 1, kind: output, shape index: {}]  }
   0x1   :  { %v112_v0 = vld [vmem:[%s344_s0 + $0x60] sm:$0xff]  ;;  %v113_v1 = vld [vmem:[%s344_s0 + $0xd0] sm:$0xff]  ;;  %v138_v14 = vld [vmem:[%s344_s0 + $0x68] sm:$0xff] }
   0x2   :  { %v115_v2 = vld [vmem:[%s344_s0 + $0x50] sm:$0xff]  ;;  %4 = vst [vmem:[%s345_s1] sm:$0xff] %v112_v0  ;;  %114 = vst [vmem:[%s345_s1 + $0x70] sm:$0xff] %v113_v1  ;;  %v117_v3 = vld [vmem:[%s344_s0 + $0xc0] sm:$0xff] }
   0x3   :  { %116 = vst [vmem:[%s345_s1 + $0x10] sm:$0xff] %v115_v2  ;;  %v119_v4 = vld [vmem:[%s344_s0 + $0x40] sm:$0xff]  ;;  %v121_v5 = vld [vmem:[%s344_s0 + $0xb0] sm:$0xff]  ;;  %118 = vst [vmem:[%s345_s1 + $0x80] sm:$0xff] %v117_v3 }
   0x4   :  { %120 = vst [vmem:[%s345_s1 + $0x20] sm:$0xff] %v119_v4  ;;  %122 = vst [vmem:[%s345_s1 + $0x90] sm:$0xff] %v121_v5  ;;  %v123_v6 = vld [vmem:[%s344_s0 + $0x30] sm:$0xff]  ;;  %v125_v7 = vld [vmem:[%s344_s0 + $0xa0] sm:$0xff] }
   0x5   :  { %v127_v8 = vld [vmem:[%s344_s0 + $0x20] sm:$0xff]  ;;  %124 = vst [vmem:[%s345_s1 + $0x30] sm:$0xff] %v123_v6  ;;  %126 = vst [vmem:[%s345_s1 + $0xa0] sm:$0xff] %v125_v7  ;;  %v129_v9 = vld [vmem:[%s344_s0 + $0x90] sm:$0xff] }
   0x6   :  { %128 = vst [vmem:[%s345_s1 + $0x40] sm:$0xff] %v127_v8  ;;  %v131_v10 = vld [vmem:[%s344_s0 + $0x10] sm:$0xff]  ;;  %v133_v11 = vld [vmem:[%s344_s0 + $0x80] sm:$0xff]  ;;  %130 = vst [vmem:[%s345_s1 + $0xb0] sm:$0xff] %v129_v9 }
   0x7   :  { %132 = vst [vmem:[%s345_s1 + $0x50] sm:$0xff] %v131_v10  ;;  %134 = vst [vmem:[%s345_s1 + $0xc0] sm:$0xff] %v133_v11  ;;  %v49_v12 = vld [vmem:[%s344_s0] sm:$0xff]  ;;  %v136_v13 = vld [vmem:[%s344_s0 + $0x70] sm:$0xff] }
   0x8   :  { %135 = vst [vmem:[%s345_s1 + $0x60] sm:$0xff] %v49_v12  ;;  %137 = vst [vmem:[%s345_s1 + $0xd0] sm:$0xff] %v136_v13  ;;  %v140_v15 = vld [vmem:[%s344_s0 + $0xd8] sm:$0xff]  ;;  %v144_v17 = vld [vmem:[%s344_s0 + $0xc8] sm:$0xff] }
   0x9   :  { %139 = vst [vmem:[%s345_s1 + $0x8] sm:$0xff] %v138_v14  ;;  %v142_v16 = vld [vmem:[%s344_s0 + $0x58] sm:$0xff]  ;;  %141 = vst [vmem:[%s345_s1 + $0x78] sm:$0xff] %v140_v15  ;;  %v146_v18 = vld [vmem:[%s344_s0 + $0x48] sm:$0xff] }
   0xa   :  { %143 = vst [vmem:[%s345_s1 + $0x18] sm:$0xff] %v142_v16  ;;  %145 = vst [vmem:[%s345_s1 + $0x88] sm:$0xff] %v144_v17  ;;  %v148_v19 = vld [vmem:[%s344_s0 + $0xb8] sm:$0xff]  ;;  %v152_v21 = vld [vmem:[%s344_s0 + $0xa8] sm:$0xff] }
   0xb   :  { %v150_v20 = vld [vmem:[%s344_s0 + $0x38] sm:$0xff]  ;;  %147 = vst [vmem:[%s345_s1 + $0x28] sm:$0xff] %v146_v18  ;;  %149 = vst [vmem:[%s345_s1 + $0x98] sm:$0xff] %v148_v19  ;;  %v154_v22 = vld [vmem:[%s344_s0 + $0x28] sm:$0xff] }
   0xc   :  { %151 = vst [vmem:[%s345_s1 + $0x38] sm:$0xff] %v150_v20  ;;  %v156_v23 = vld [vmem:[%s344_s0 + $0x98] sm:$0xff]  ;;  %153 = vst [vmem:[%s345_s1 + $0xa8] sm:$0xff] %v152_v21  ;;  %v160_v25 = vld [vmem:[%s344_s0 + $0x88] sm:$0xff] }
   0xd   :  { %155 = vst [vmem:[%s345_s1 + $0x48] sm:$0xff] %v154_v22  ;;  %157 = vst [vmem:[%s345_s1 + $0xb8] sm:$0xff] %v156_v23  ;;  %v158_v24 = vld [vmem:[%s344_s0 + $0x18] sm:$0xff]  ;;  %v162_v26 = vld [vmem:[%s344_s0 + $0x8] sm:$0xff] }
   0xe   :  { %159 = vst [vmem:[%s345_s1 + $0x58] sm:$0xff] %v158_v24  ;;  %161 = vst [vmem:[%s345_s1 + $0xc8] sm:$0xff] %v160_v25  ;;  %v164_v27 = vld [vmem:[%s344_s0 + $0x78] sm:$0xff] }
   0xf   :  { %163 = vst [vmem:[%s345_s1 + $0x68] sm:$0xff] %v162_v26  ;;  %165 = vst [vmem:[%s345_s1 + $0xd8] sm:$0xff] %v164_v27 }

// kernel: distributed_block_forward.6
= control target key start
LH: loop header
LB: loop body
LE: loop exit
PB: predicated region body
PF: predicated region fallthrough
CT: control target
= control target key end

     0   :  { %12 = vsyncpa [#allocation3], 0  ;;  %s655_s0 = inlined_call_operand.hbm [shape: f32[32,256], index: 0, kind: input, shape index: {}]   ;;  %s656_s1 = inlined_call_operand.hbm [shape: f32[32,256], index: 1, kind: input, shape index: {}]   ;;  %s657_s2 = inlined_call_operand.hbm [shape: f32[32,256], index: 2, kind: input, shape index: {}]   ;;  %s658_s3 = inlined_call_operand.hbm [shape: f32[1,256], index: 3, kind: input, shape index: {}]   ;;  %s659_s4 = inlined_call_operand.hbm [shape: f32[1,256], index: 4, kind: input, shape index: {}]   ;;  %s660_s5 = inlined_call_operand.hbm [shape: f32[32,256], index: 5, kind: output, shape index: {0}]   ;;  %s661_s6 = inlined_call_operand.hbm [shape: f32[32,256], index: 6, kind: output, shape index: {1}]  }
   0x1   :  { %13 = vsyncpa [#allocation6], 0 }
   0x2   :  { %14 = vsyncpa [#allocation9], 0 }
   0x3   :  { %15 = vsyncpa [#allocation4], 0 }
   0x4   :  { %16 = vsyncpa [#allocation13], 0  ;;  %s465_s21 = smov [#allocation5]   ;;  %s466_s23 = smov [#allocation8]  }
   0x5   :  { %s34_s22 = sshll.u32 %s465_s21, 4  ;;  %s59_s24 = sshll.u32 %s466_s23, 4  ;;  %s35_s22 = int_to_ptr.vmem [resolvable:$true] %s34_s22  ;;  %s60_s24 = int_to_ptr.vmem [resolvable:$true] %s59_s24 }
   0x6   :  { %s301_s27 = scalar_lea.hbm %s656_s1, 1024 }
   0x7   :  { %p302_p0 = scmp.ne.s32.totalorder %s656_s1, %s301_s27  ;;  %p305_p1 = scmp.lt.u32.totalorder %s301_s27, %s656_s1 }
   0x9   :  { %p307_p2 = pnand %p305_p1, %p302_p0 }
   0xb   :  { %310 = shalt.err (!%p307_p2)
}
   0xc   :  { %s311_s8 = scalar_lea.vmem %s35_s22, 1024  ;;  %p316_p4 = scmp.lt.s32.totalorder %s35_s22, %s35_s22 }
   0xd   :  { %p312_p3 = scmp.ne.s32.totalorder %s35_s22, %s311_s8  ;;  %p317_p5 = scmp.lt.s32.totalorder %s311_s8, %s311_s8 }
   0xf   :  { %p318_p6 = por %p317_p5, %p316_p4 }
  0x11   :  { %p319_p7 = pnand %p318_p6, %p312_p3 }
  0x13   :  { %322 = shalt.err (!%p319_p7)
}
  0x14   :  { %s467_s9 = smov 256   ;;  %s468_s10 = smov 16  }
  0x15   :  { %40 = dma.hbm_to_vmem [thread:$0]  %s656_s1, 1024, %s35_s22, [#allocation6], %s467_s9, %s467_s9, %s468_s10  }
  0x16   :  { %s323_s15 = scalar_lea.hbm %s658_s3, 32 }
  0x17   :  { %p324_p8 = scmp.ne.s32.totalorder %s658_s3, %s323_s15  ;;  %p327_p9 = scmp.lt.u32.totalorder %s323_s15, %s658_s3 }
  0x19   :  { %p329_p10 = pnand %p327_p9, %p324_p8 }
  0x1b   :  { %332 = shalt.err (!%p329_p10)
}
  0x1c   :  { %s333_s20 = scalar_lea.vmem %s60_s24, 32  ;;  %p338_p12 = scmp.lt.s32.totalorder %s60_s24, %s60_s24 }
  0x1d   :  { %p334_p11 = scmp.ne.s32.totalorder %s60_s24, %s333_s20  ;;  %p339_p13 = scmp.lt.s32.totalorder %s333_s20, %s333_s20 }
  0x1f   :  { %p340_p0 = por %p339_p13, %p338_p12 }
  0x21   :  { %p341_p1 = pnand %p340_p0, %p334_p11 }
  0x23   :  { %344 = shalt.err (!%p341_p1)
}
  0x24   :  { %62 = dma.hbm_to_vmem [thread:$0]  %s658_s3, 32, %s60_s24, [#allocation9]  }
  0x25   :  { %s469_s22 = smov [#allocation2]   ;;  %s470_s25 = smov [#allocation7]  }
  0x26   :  { %s22_s23 = sshll.u32 %s469_s22, 4  ;;  %s46_s26 = sshll.u32 %s470_s25, 4  ;;  %s23_s23 = int_to_ptr.vmem [resolvable:$true] %s22_s23  ;;  %s536_s26 = int_to_ptr.vmem [resolvable:$true] %s46_s26 }
  0x27   :  { %s345_s29 = scalar_lea.hbm %s655_s0, 1024 }
  0x28   :  { %p346_p2 = scmp.ne.s32.totalorder %s655_s0, %s345_s29  ;;  %p349_p3 = scmp.lt.u32.totalorder %s345_s29, %s655_s0 }
  0x2a   :  { %p351_p4 = pnand %p349_p3, %p346_p2 }
  0x2c   :  { %354 = shalt.err (!%p351_p4)
}
  0x2d   :  { %s355_s3 = scalar_lea.vmem %s23_s23, 1024  ;;  %p360_p6 = scmp.lt.s32.totalorder %s23_s23, %s23_s23 }
  0x2e   :  { %p356_p5 = scmp.ne.s32.totalorder %s23_s23, %s355_s3  ;;  %p361_p7 = scmp.lt.s32.totalorder %s355_s3, %s355_s3 }
  0x30   :  { %p362_p8 = por %p361_p7, %p360_p6 }
  0x32   :  { %p363_p9 = pnand %p362_p8, %p356_p5 }
  0x34   :  { %366 = shalt.err (!%p363_p9)
}
  0x35   :  { %28 = dma.hbm_to_vmem [thread:$0]  %s655_s0, 1024, %s23_s23, [#allocation3], %s467_s9, %s467_s9, %s468_s10  }
  0x36   :  { %s367_s15 = scalar_lea.hbm %s657_s2, 1024 }
  0x37   :  { %p368_p10 = scmp.ne.s32.totalorder %s657_s2, %s367_s15  ;;  %p371_p11 = scmp.lt.u32.totalorder %s367_s15, %s657_s2 }
  0x39   :  { %p373_p12 = pnand %p371_p11, %p368_p10 }
  0x3b   :  { %376 = shalt.err (!%p373_p12)
}
  0x3c   :  { %s377_s20 = scalar_lea.vmem %s536_s26, 1024  ;;  %p382_p0 = scmp.lt.s32.totalorder %s536_s26, %s536_s26 }
  0x3d   :  { %p378_p13 = scmp.ne.s32.totalorder %s536_s26, %s377_s20  ;;  %p383_p1 = scmp.lt.s32.totalorder %s377_s20, %s377_s20 }
  0x3f   :  { %p384_p2 = por %p383_p1, %p382_p0 }
  0x41   :  { %p385_p3 = pnand %p384_p2, %p378_p13 }
  0x43   :  { %388 = shalt.err (!%p385_p3)
}
  0x44   :  { %52 = dma.hbm_to_vmem [thread:$0]  %s657_s2, 1024, %s536_s26, [#allocation6], %s467_s9, %s467_s9, %s468_s10  }
  0x45   :  { %s471_s21 = smov [#allocation10]   ;;  %s389_s27 = scalar_lea.hbm %s659_s4, 32 }
  0x46   :  { %s69_s22 = sshll.u32 %s471_s21, 4  ;;  %p390_p4 = scmp.ne.s32.totalorder %s659_s4, %s389_s27  ;;  %s70_s22 = int_to_ptr.vmem [resolvable:$true] %s69_s22 }
  0x47   :  { %p393_p5 = scmp.lt.u32.totalorder %s389_s27, %s659_s4 }
  0x49   :  { %p395_p6 = pnand %p393_p5, %p390_p4 }
  0x4b   :  { %398 = shalt.err (!%p395_p6)
}
  0x4c   :  { %s399_s8 = scalar_lea.vmem %s70_s22, 32  ;;  %p404_p8 = scmp.lt.s32.totalorder %s70_s22, %s70_s22 }
  0x4d   :  { %p400_p7 = scmp.ne.s32.totalorder %s70_s22, %s399_s8  ;;  %p405_p9 = scmp.lt.s32.totalorder %s399_s8, %s399_s8 }
  0x4f   :  { %p406_p10 = por %p405_p9, %p404_p8 }
  0x51   :  { %p407_p11 = pnand %p406_p10, %p400_p7 }
  0x53   :  { %410 = shalt.err (!%p407_p11)
}
  0x54   :  { %72 = dma.hbm_to_vmem [thread:$0]  %s659_s4, 32, %s70_s22, [#allocation9]  }
  0x55   :  { %455 = dma.done.wait [#allocation3], 1024  }
  0x56   :  { %456 = vsyncadd [#allocation3], 4294966272 }
  0x57   :  { %457 = dma.done.wait [#allocation6], 2048  }
  0x58   :  { %458 = vsyncadd [#allocation6], 4294965248 }
  0x59   :  { %459 = dma.done.wait [#allocation9], 64  }
  0x5a   :  { %460 = vsyncadd [#allocation9], 4294967232  ;;  %v88_v0 = vld [vmem:[#allocation2] sm:$0xff]  ;;  %v89_v1 = vld [vmem:[#allocation2 + $0x8] sm:$0xff]  ;;  %s472_s4 = smov [#allocation11]  }
  0x5b   :  { %v96_v2 = vld [vmem:[#allocation5] sm:$0xff]  ;;  %v97_v3 = vld [vmem:[#allocation5 + $0x8] sm:$0xff]  ;;  %v90_v18 = vld [vmem:[#allocation2 + $0x10] sm:$0xff]  ;;  %s254_s11 = sshll.u32 %s472_s4, 4  ;;  %s255_s11 = int_to_ptr.vmem [resolvable:$true] %s254_s11 }
  0x5c   :  { %v104_v4 = vadd.f32 %v96_v2, %v88_v0  ;;  %v112_v5 = vld [vmem:[#allocation7] sm:$0xff]  ;;  %v113_v6 = vld [vmem:[#allocation7 + $0x8] sm:$0xff]  ;;  %v105_v7 = vadd.f32 %v97_v3, %v89_v1  ;;  %v91_v19 = vld [vmem:[#allocation2 + $0x18] sm:$0xff]  ;;  %s411_s3 = scalar_lea.vmem %s255_s11, 1024  ;;  %p416_p13 = scmp.lt.s32.totalorder %s255_s11, %s255_s11 }
  0x5d   :  { %v92_v8 = vld [vmem:[#allocation2 + $0x20] sm:$0xff]  ;;  %v93_v9 = vld [vmem:[#allocation2 + $0x28] sm:$0xff]  ;;  %v98_v20 = vld [vmem:[#allocation5 + $0x10] sm:$0xff]  ;;  %p412_p12 = scmp.ne.s32.totalorder %s255_s11, %s411_s3  ;;  %p417_p0 = scmp.lt.s32.totalorder %s411_s3, %s411_s3 }
  0x5e   :  { %v100_v10 = vld [vmem:[#allocation5 + $0x20] sm:$0xff]  ;;  %v120_v11 = vadd.f32 %v112_v5, %v104_v4  ;;  %v101_v12 = vld [vmem:[#allocation5 + $0x28] sm:$0xff]  ;;  %v121_v16 = vadd.f32 %v113_v6, %v105_v7  ;;  %v99_v22 = vld [vmem:[#allocation5 + $0x18] sm:$0xff]  ;;  %v106_v23 = vadd.f32 %v98_v20, %v90_v18 }
  0x5f   :  { %v108_v13 = vadd.f32 %v100_v10, %v92_v8  ;;  %v116_v14 = vld [vmem:[#allocation7 + $0x20] sm:$0xff]  ;;  %v117_v15 = vld [vmem:[#allocation7 + $0x28] sm:$0xff]  ;;  %v109_v17 = vadd.f32 %v101_v12, %v93_v9  ;;  %v114_v24 = vld [vmem:[#allocation7 + $0x10] sm:$0xff]  ;;  %v107_v28 = vadd.f32 %v99_v22, %v91_v19  ;;  %p418_p1 = por %p417_p0, %p416_p13 }
  0x60   :  { %128 = vst [vmem:[#allocation11] sm:$0xff] %v120_v11  ;;  %v115_v25 = vld [vmem:[#allocation7 + $0x18] sm:$0xff]  ;;  %129 = vst [vmem:[#allocation11 + $0x8] sm:$0xff] %v121_v16  ;;  %v136_v26 = vadd.f32 %v121_v16, %v120_v11  ;;  %v94_v29 = vld [vmem:[#allocation2 + $0x30] sm:$0xff]  ;;  %v122_v32 = vadd.f32 %v114_v24, %v106_v23 }
  0x61   :  { %v124_v21 = vadd.f32 %v116_v14, %v108_v13  ;;  %v125_v27 = vadd.f32 %v117_v15, %v109_v17  ;;  %v95_v30 = vld [vmem:[#allocation2 + $0x38] sm:$0xff]  ;;  %v102_v31 = vld [vmem:[#allocation5 + $0x30] sm:$0xff]  ;;  %v123_v38 = vadd.f32 %v115_v25, %v107_v28  ;;  %p419_p2 = pnand %p418_p1, %p412_p12 }
  0x62   :  { %v103_v33 = vld [vmem:[#allocation5 + $0x38] sm:$0xff]  ;;  %v110_v34 = vadd.f32 %v102_v31, %v94_v29  ;;  %v118_v35 = vld [vmem:[#allocation7 + $0x30] sm:$0xff]  ;;  %137 = vadd.xlane.f32.xlu0 %v136_v26  ;;  %130 = vst [vmem:[#allocation11 + $0x10] sm:$0xff] %v122_v32 }
  0x63   :  { %132 = vst [vmem:[#allocation11 + $0x20] sm:$0xff] %v124_v21  ;;  %v119_v36 = vld [vmem:[#allocation7 + $0x38] sm:$0xff]  ;;  %133 = vst [vmem:[#allocation11 + $0x28] sm:$0xff] %v125_v27  ;;  %v142_v37 = vadd.f32 %v125_v27, %v124_v21  ;;  %v111_v39 = vadd.f32 %v103_v33, %v95_v30  ;;  %v139_v41 = vadd.f32 %v123_v38, %v122_v32 }
  0x64   :  { %v126_v40 = vadd.f32 %v118_v35, %v110_v34  ;;  %131 = vst [vmem:[#allocation11 + $0x18] sm:$0xff] %v123_v38 }
  0x65   :  { %143 = vadd.xlane.f32.xlu1 %v142_v37  ;;  %v127_v42 = vadd.f32 %v119_v36, %v111_v39 }
  0x66   :  { %134 = vst [vmem:[#allocation11 + $0x30] sm:$0xff] %v126_v40  ;;  %140 = vadd.xlane.f32.xlu0 %v139_v41 }
  0x67   :  { %135 = vst [vmem:[#allocation11 + $0x38] sm:$0xff] %v127_v42  ;;  %v145_v43 = vadd.f32 %v127_v42, %v126_v40 }
  0x69   :  { %146 = vadd.xlane.f32.xlu1 %v145_v43 }
  0xef   :  { %v138_v44 = vpop.xlane.xlu0 %137 }
  0xf0   :  { %v149_v45 = vmul.f32 0.00390625, %v138_v44 }
  0xf2   :  { %v144_v46 = vpop.xlane.xlu1 %143  ;;  %v585_v47 = vsub.f32 %v120_v11, %v149_v45  ;;  %v587_v48 = vsub.f32 %v121_v16, %v149_v45 }
  0xf3   :  { %v151_v49 = vmul.f32 0.00390625, %v144_v46  ;;  %v141_v50 = vpop.xlane.xlu0 %140 }
  0xf4   :  { %v150_v53 = vmul.f32 0.00390625, %v141_v50  ;;  %v161_v54 = vmul.f32 %v585_v47, %v585_v47  ;;  %v162_v56 = vmul.f32 %v587_v48, %v587_v48 }
  0xf5   :  { %v589_v51 = vsub.f32 %v124_v21, %v151_v49  ;;  %v591_v52 = vsub.f32 %v125_v27, %v151_v49 }
  0xf6   :  { %v147_v55 = vpop.xlane.xlu1 %146  ;;  %v597_v57 = vsub.f32 %v122_v32, %v150_v53  ;;  %v599_v58 = vsub.f32 %v123_v38, %v150_v53  ;;  %v169_v61 = vadd.f32 %v162_v56, %v161_v54 }
  0xf7   :  { %v152_v59 = vmul.f32 0.00390625, %v147_v55  ;;  %v165_v60 = vmul.f32 %v589_v51, %v589_v51  ;;  %v166_v62 = vmul.f32 %v591_v52, %v591_v52 }
  0xf8   :  { %v163_v1 = vmul.f32 %v597_v57, %v597_v57  ;;  %v164_v2 = vmul.f32 %v599_v58, %v599_v58  ;;  %170 = vadd.xlane.f32.xlu0 %v169_v61 }
  0xf9   :  { %v605_v63 = vsub.f32 %v126_v40, %v152_v59  ;;  %v607_v0 = vsub.f32 %v127_v42, %v152_v59  ;;  %v175_v3 = vadd.f32 %v166_v62, %v165_v60 }
  0xfa   :  { %v172_v4 = vadd.f32 %v164_v2, %v163_v1 }
  0xfb   :  { %v167_v5 = vmul.f32 %v605_v63, %v605_v63  ;;  %v168_v6 = vmul.f32 %v607_v0, %v607_v0 }
  0xfc   :  { %173 = vadd.xlane.f32.xlu1 %v172_v4  ;;  %176 = vadd.xlane.f32.xlu0 %v175_v3 }
  0xfd   :  { %v178_v7 = vadd.f32 %v168_v6, %v167_v5 }
 0x100   :  { %179 = vadd.xlane.f32.xlu1 %v178_v7 }
 0x101   :  { %422 = shalt.err (!%p419_p2)
}
 0x102   :  { %s423_s13 = scalar_lea.hbm %s660_s5, 1024 }
 0x103   :  { %p424_p3 = scmp.ne.s32.totalorder %s660_s5, %s423_s13  ;;  %p427_p4 = scmp.lt.u32.totalorder %s423_s13, %s660_s5 }
 0x105   :  { %p429_p5 = pnand %p427_p4, %p424_p3 }
 0x107   :  { %432 = shalt.err (!%p429_p5)
}
 0x108   :  { %260 = dma.vmem_to_hbm [thread:$0]  %s255_s11, 1024, %s660_s5, [#allocation4], %s467_s9, %s467_s9, %s468_s10   ;;  %v203_v10 = vlaneseq  ;;  %v201_v24 = vld [vmem:[#allocation8] sm:$0x3]  ;;  %v221_v25 = vld [vmem:[#allocation10] sm:$0x3] }
 0x109   :  { %s473_s5 = smov [#allocation12]  }
 0x10a   :  { %v204_v16 = vshrl.u32 %v203_v10, 7  ;;  %s266_s20 = sshll.u32 %s473_s5, 4  ;;  %s267_s20 = int_to_ptr.vmem [resolvable:$true] %s266_s20 }
 0x10b   :  { %s433_s0 = scalar_lea.vmem %s267_s20, 1024  ;;  %p438_p7 = scmp.lt.s32.totalorder %s267_s20, %s267_s20 }
 0x10c   :  { %v205_v21 = vsub.s32 0, %v204_v16  ;;  %v209_v22 = vsub.s32 1, %v204_v16  ;;  %p434_p6 = scmp.ne.s32.totalorder %s267_s20, %s433_s0  ;;  %p439_p8 = scmp.lt.s32.totalorder %s433_s0, %s433_s0 }
 0x10e   :  { %v206_v26 = vrot.slane %v201_v24, %v205_v21  ;;  %v210_v27 = vrot.slane %v201_v24, %v209_v22  ;;  %v226_v29 = vrot.slane %v221_v25, %v205_v21  ;;  %v230_v30 = vrot.slane %v221_v25, %v209_v22  ;;  %p440_p9 = por %p439_p8, %p438_p7 }
 0x110   :  { %p441_p10 = pnand %p440_p9, %p434_p6 }
 0x185   :  { %v171_v8 = vpop.xlane.xlu0 %170 }
 0x186   :  { %v181_v9 = vmul.f32 0.00390625, %v171_v8 }
 0x188   :  { %v185_v11 = vadd.f32 1e-05, %v181_v9 }
 0x189   :  { %v174_v12 = vpop.xlane.xlu1 %173  ;;  %v177_v14 = vpop.xlane.xlu0 %176 }
 0x18a   :  { %v182_v13 = vmul.f32 0.00390625, %v174_v12  ;;  %293 = vrsqrt.f32 %v185_v11  ;;  %v183_v15 = vmul.f32 0.00390625, %v177_v14 }
 0x18c   :  { %v186_v17 = vadd.f32 1e-05, %v182_v13  ;;  %v187_v18 = vadd.f32 1e-05, %v183_v15 }
 0x18d   :  { %v180_v19 = vpop.xlane.xlu1 %179 }
 0x18e   :  { %295 = vrsqrt.f32 %v186_v17  ;;  %v184_v20 = vmul.f32 0.00390625, %v180_v19 }
 0x18f   :  { %297 = vrsqrt.f32 %v187_v18 }
 0x190   :  { %v188_v23 = vadd.f32 1e-05, %v184_v20 }
 0x192   :  { %299 = vrsqrt.f32 %v188_v23 }
 0x194   :  { %v294_v28 = vpop.eup %293 }
 0x195   :  { %v193_v31 = vmul.f32 %v294_v28, %v585_v47  ;;  %v194_v32 = vmul.f32 %v294_v28, %v587_v48 }
 0x197   :  { %v213_v34 = vmul.f32 %v206_v26, %v193_v31  ;;  %v214_v35 = vmul.f32 %v210_v27, %v194_v32 }
 0x198   :  { %v296_v33 = vpop.eup %295 }
 0x199   :  { %v298_v36 = vpop.eup %297  ;;  %v195_v37 = vmul.f32 %v296_v33, %v597_v57  ;;  %v196_v38 = vmul.f32 %v296_v33, %v599_v58  ;;  %v233_v39 = vadd.f32 %v226_v29, %v213_v34  ;;  %v234_v40 = vadd.f32 %v230_v30, %v214_v35 }
 0x19a   :  { %v197_v41 = vmul.f32 %v298_v36, %v589_v51  ;;  %v198_v42 = vmul.f32 %v298_v36, %v591_v52 }
 0x19b   :  { %v215_v43 = vmul.f32 %v206_v26, %v195_v37  ;;  %v216_v44 = vmul.f32 %v210_v27, %v196_v38  ;;  %241 = vst [vmem:[#allocation12] sm:$0xff] %v233_v39  ;;  %242 = vst [vmem:[#allocation12 + $0x8] sm:$0xff] %v234_v40 }
 0x19c   :  { %v300_v45 = vpop.eup %299  ;;  %v217_v46 = vmul.f32 %v206_v26, %v197_v41  ;;  %v218_v47 = vmul.f32 %v210_v27, %v198_v42 }
 0x19d   :  { %v235_v48 = vadd.f32 %v226_v29, %v215_v43  ;;  %v236_v49 = vadd.f32 %v230_v30, %v216_v44  ;;  %v199_v50 = vmul.f32 %v300_v45, %v605_v63  ;;  %v200_v53 = vmul.f32 %v300_v45, %v607_v0 }
 0x19e   :  { %v237_v54 = vadd.f32 %v226_v29, %v217_v46  ;;  %v238_v55 = vadd.f32 %v230_v30, %v218_v47 }
 0x19f   :  { %243 = vst [vmem:[#allocation12 + $0x10] sm:$0xff] %v235_v48  ;;  %244 = vst [vmem:[#allocation12 + $0x18] sm:$0xff] %v236_v49  ;;  %v219_v51 = vmul.f32 %v206_v26, %v199_v50  ;;  %v220_v52 = vmul.f32 %v210_v27, %v200_v53 }
 0x1a0   :  { %245 = vst [vmem:[#allocation12 + $0x20] sm:$0xff] %v237_v54  ;;  %246 = vst [vmem:[#allocation12 + $0x28] sm:$0xff] %v238_v55 }
 0x1a1   :  { %v239_v56 = vadd.f32 %v226_v29, %v219_v51  ;;  %v240_v57 = vadd.f32 %v230_v30, %v220_v52 }
 0x1a3   :  { %247 = vst [vmem:[#allocation12 + $0x30] sm:$0xff] %v239_v56  ;;  %248 = vst [vmem:[#allocation12 + $0x38] sm:$0xff] %v240_v57 }
 0x1a4   :  { %444 = shalt.err (!%p441_p10)
}
 0x1a5   :  { %s445_s22 = scalar_lea.hbm %s661_s6, 1024 }
 0x1a6   :  { %p446_p11 = scmp.ne.s32.totalorder %s661_s6, %s445_s22  ;;  %p449_p12 = scmp.lt.u32.totalorder %s445_s22, %s661_s6 }
 0x1a8   :  { %p451_p13 = pnand %p449_p12, %p446_p11 }
 0x1aa   :  { %454 = shalt.err (!%p451_p13)
}
 0x1ab   :  { %272 = dma.vmem_to_hbm [thread:$0]  %s267_s20, 1024, %s661_s6, [#allocation13], %s467_s9, %s467_s9, %s468_s10  }
 0x1ac   :  { %461 = dma.done.wait [#allocation4], 1024  }
 0x1ad   :  { %462 = vsyncadd [#allocation4], 4294966272 }
 0x1ae   :  { %463 = dma.done.wait [#allocation13], 1024  }
 0x1af   :  { %464 = vsyncadd [#allocation13], 4294966272 }
 0x1b0   :  { %279 = vsyncpa [#allocation3], 1 }
 0x1b1   :  { %280 = vsyncpa [#allocation6], 1 }
 0x1b2   :  { %281 = vsyncpa [#allocation9], 1 }
 0x1b3   :  { %282 = vsyncpa [#allocation4], 1 }
 0x1b4   :  { %283 = vsyncpa [#allocation13], 1 }

// kernel: distributed_block_forward.7
= control target key start
LH: loop header
LB: loop body
LE: loop exit
PB: predicated region body
PF: predicated region fallthrough
CT: control target
= control target key end

     0   :  { %s1794_s0 = inlined_call_operand.hbm [shape: f32[2,16,256], index: 0, kind: input, shape index: {}]   ;;  %s1795_s1 = inlined_call_operand.hbm [shape: bf16[64,16], index: 1, kind: input, shape index: {}]   ;;  %s1796_s2 = inlined_call_operand.hbm [shape: f32[64,1], index: 2, kind: input, shape index: {}]   ;;  %s1797_s3 = inlined_call_operand.hbm [shape: bf16[16,64], index: 3, kind: input, shape index: {}]   ;;  %s1798_s4 = inlined_call_operand.hbm [shape: f32[16,1], index: 4, kind: input, shape index: {}]   ;;  %s1799_s5 = inlined_call_operand.hbm [shape: f32[2,16,256], index: 5, kind: input, shape index: {}]   ;;  %s1800_s6 = inlined_call_operand.hbm [shape: f32[2,16,256], index: 6, kind: output, shape index: {}]  }
   0x1   :  { %1808 = sst [smem:[#allocation21_spill]] %s1794_s0 }
   0x2   :  { %1809 = sst [smem:[#allocation22_spill]] %s1795_s1 }
   0x3   :  { %1810 = sst [smem:[#allocation23_spill]] %s1800_s6 }
   0x4   :  { %11 = vsyncpa [#allocation3], 0 }
   0x5   :  { %13 = vsyncpa [#allocation3 + $0x1], 0 }
   0x6   :  { %14 = vsyncpa [#allocation6], 0 }
   0x7   :  { %15 = vsyncpa [#allocation9], 0 }
   0x8   :  { %16 = vsyncpa [#allocation12], 0 }
   0x9   :  { %18 = vsyncpa [#allocation12 + $0x1], 0 }
   0xa   :  { %19 = vsyncpa [#allocation4], 0 }
   0xb   :  { %21 = vsyncpa [#allocation4 + $0x1], 0  ;;  %s1410_s21 = smov 0   ;;  %s1412_s22 = smov 0  }
   0xc   :  { %s1414_s23 = smov 0   ;;  %s1416_s24 = smov 0  }
   0xd   :  { %s1418_s25 = smov 0   ;;  %s1420_s26 = smov 0  }
   0xe LB: > { %1811 = sst [smem:[#allocation19_spill]] %s1337_s21  ;;  %s895_s27 = sadd.s32 4294967295, %s1357_s26   ;;  %s1357_s26 = sphi %s1420_s26, %s27_s26   ;;  %s1353_s25 = sphi %s1418_s25, %s1837_s25   ;;  %s1349_s24 = sphi %s1416_s24, %s1836_s24   ;;  %s1345_s23 = sphi %s1414_s23, %s1835_s23   ;;  %s1341_s22 = sphi %s1412_s22, %s1834_s22   ;;  %s1337_s21 = sphi %s1410_s21, %s1833_s21  }
   0xf   : > { %s896_s28 = sadd.s32 4294967294, %s1357_s26   ;;  %p61_p0 = scmp.ne.s32.totalorder %s1341_s22, %s1337_s21 }
  0x10   : > { %p1444_p1 = scmp.eq.s32.totalorder %s895_s27, 0  ;;  %p1448_p2 = scmp.eq.s32.totalorder %s895_s27, 1 }
  0x11   : > { %p205_p3 = scmp.eq.s32.totalorder %s896_s28, 1  ;;  %p897_p5 = scmp.ge.s32.totalorder %s1357_s26, 1 }
  0x12   : > { %s1812_s29 = scalar_select %p1444_p1, 1, 0 }
  0x13   : > { %s1813_s30 = scalar_select %p1448_p2, 1, 0 }
  0x14   : > { %p1454_p4 = por %p1444_p1, %p61_p0  ;;  %p1459_p6 = por %p205_p3, %p61_p0 }
  0x15   : > { %p212_p7 = scmp.lt.s32.totalorder %s1357_s26, 3  ;;  %s1359_s10 = smov [#allocation5]  }
  0x16   : > { %s1814_s7 = scalar_select %p1454_p4, 1, 0 }
  0x17   : > { %s1815_s8 = scalar_select %p1459_p6, 1, 0 }
  0x18   : > { %p1464_p8 = pnand %p897_p5, %p212_p7  ;;  %s224_s11 = sshll.u32 %s1359_s10, 4  ;;  %s1468_s11 = int_to_ptr.vmem [resolvable:$true] %s224_s11 }
  0x19   : > { %1816 = sst [smem:[#allocation20_spill]] %s1815_s8  ;;  %s1360_s13 = smov [#allocation8]  }
  0x1a   : > { %s1817_s9 = scalar_select %p1464_p8, 1, 0 }
  0x1b   : > { %p957_p9 = pneg %p1464_p8  ;;  %s250_s14 = sshll.u32 %s1360_s13, 4  ;;  %s1479_s14 = int_to_ptr.vmem [resolvable:$true] %s250_s14 }
  0x1c   : > { %s1361_s15 = smov [#allocation7]   ;;  %s1819_s1 = sld [smem:[#allocation22_spill]] }
  0x1d   : > { %p1475_p11 = pnand %p957_p9, %p1444_p1  ;;  %s1481_s16 = sshll.u32 %s1361_s15, 4  ;;  %s238_s16 = int_to_ptr.vmem [resolvable:$true] %s1481_s16 }
  0x1f   : > { %p1491_p13 = pneg %p1475_p11 }
  0x22   : > { %s1091_s19 = scalar_lea.hbm %s1819_s1, 512 }
  0x23   : > { %p1092_p12 = scmp.ne.s32.totalorder %s1819_s1, %s1091_s19  ;;  %p1098_p5 = scmp.lt.u32.totalorder %s1091_s19, %s1819_s1 }
  0x25   : > { %p1094_p0 = pnand %p1491_p13, %p1092_p12 }
  0x27   : > { %p1095_p3 = pneg %p1094_p0 }
  0x29   : > { %p1100_p7 = pnand %p1098_p5, %p1095_p3 }
  0x2b   : > { %1103 = shalt.err (!%p1100_p7)
}
  0x2c   : > { %s1104_s15 = scalar_lea.vmem %s1468_s11, 512  ;;  %p1112_p1 = scmp.lt.s32.totalorder %s1468_s11, %s1468_s11 }
  0x2d   : > { %p1105_p9 = scmp.ne.s32.totalorder %s1468_s11, %s1104_s15  ;;  %p1113_p4 = scmp.lt.s32.totalorder %s1104_s15, %s1104_s15 }
  0x2f   : > { %p1107_p10 = pnand %p1105_p9, %p1491_p13  ;;  %p1114_p12 = por %p1113_p4, %p1112_p1 }
  0x31   : > { %p1108_p6 = pneg %p1107_p10 }
  0x33   : > { %p1115_p0 = pnand %p1114_p12, %p1108_p6 }
  0x35   : > { %1118 = shalt.err (!%p1115_p0)
}
  0x36   : > { %s1362_s17 = smov 64   ;;  %s1363_s18 = smov 4  }
  0x37   : > { %960 = dma.hbm_to_vmem [thread:$0]  (!%p1475_p11), %s1819_s1, 512, %s1468_s11, [#allocation6], %s1362_s17, %s1362_s17, %s1363_s18  }
  0x38   : > { %s1119_s13 = scalar_lea.hbm %s1797_s3, 128 }
  0x39   : > { %p1120_p1 = scmp.ne.s32.totalorder %s1797_s3, %s1119_s13  ;;  %p1126_p10 = scmp.lt.u32.totalorder %s1119_s13, %s1797_s3 }
  0x3b   : > { %p1122_p4 = pnand %p1120_p1, %p1491_p13 }
  0x3d   : > { %p1123_p6 = pneg %p1122_p4 }
  0x3f   : > { %p1128_p3 = pnand %p1126_p10, %p1123_p6 }
  0x41   : > { %1131 = shalt.err (!%p1128_p3)
}
  0x42   : > { %s1132_s11 = scalar_lea.vmem %s1479_s14, 128  ;;  %p1140_p12 = scmp.lt.s32.totalorder %s1479_s14, %s1479_s14 }
  0x43   : > { %p1133_p5 = scmp.ne.s32.totalorder %s1479_s14, %s1132_s11  ;;  %p1141_p0 = scmp.lt.s32.totalorder %s1132_s11, %s1132_s11 }
  0x45   : > { %p1135_p7 = pnand %p1133_p5, %p1491_p13  ;;  %p1142_p1 = por %p1141_p0, %p1140_p12 }
  0x47   : > { %p1136_p9 = pneg %p1135_p7 }
  0x49   : > { %p1143_p4 = pnand %p1142_p1, %p1136_p9 }
  0x4b   : > { %1146 = shalt.err (!%p1143_p4)
}
  0x4c   : > { %966 = dma.hbm_to_vmem [thread:$0]  (!%p1475_p11), %s1797_s3, 128, %s1479_s14, [#allocation9], %s1362_s17, %s1362_s17, %s1363_s18  }
  0x4d   : > { %s1147_s20 = scalar_lea.hbm %s1796_s2, 1024 }
  0x4e   : > { %p1148_p6 = scmp.ne.s32.totalorder %s1796_s2, %s1147_s20  ;;  %p1154_p5 = scmp.lt.u32.totalorder %s1147_s20, %s1796_s2 }
  0x50   : > { %p1150_p10 = pnand %p1148_p6, %p1491_p13 }
  0x52   : > { %p1151_p3 = pneg %p1150_p10 }
  0x54   : > { %p1156_p7 = pnand %p1154_p5, %p1151_p3 }
  0x56   : > { %1159 = shalt.err (!%p1156_p7)
}
  0x57   : > { %s1160_s11 = scalar_lea.vmem %s238_s16, 1024  ;;  %p1168_p1 = scmp.lt.s32.totalorder %s238_s16, %s238_s16 }
  0x58   : > { %p1161_p9 = scmp.ne.s32.totalorder %s238_s16, %s1160_s11  ;;  %p1169_p4 = scmp.lt.s32.totalorder %s1160_s11, %s1160_s11 }
  0x5a   : > { %p1163_p12 = pnand %p1161_p9, %p1491_p13  ;;  %p1170_p8 = por %p1169_p4, %p1168_p1 }
  0x5c   : > { %p1164_p0 = pneg %p1163_p12 }
  0x5e   : > { %p1171_p2 = pnand %p1170_p8, %p1164_p0 }
  0x60   : > { %1174 = shalt.err (!%p1171_p2)
}
  0x61   : > { %s1364_s14 = smov 128   ;;  %s1365_s17 = smov 8  }
  0x62   : > { %963 = dma.hbm_to_vmem [thread:$0]  (!%p1475_p11), %s1796_s2, 1024, %s238_s16, [#allocation6], %s1364_s14, %s1364_s14, %s1365_s17  }
  0x63   : > { %s1366_s21 = smov [#allocation10]   ;;  %s1175_s27 = scalar_lea.hbm %s1798_s4, 256 }
  0x64   : > { %s263_s8 = sshll.u32 %s1366_s21, 4  ;;  %p1176_p2 = scmp.ne.s32.totalorder %s1798_s4, %s1175_s27  ;;  %s264_s8 = int_to_ptr.vmem [resolvable:$true] %s263_s8 }
  0x65   : > { %p1182_p10 = scmp.lt.u32.totalorder %s1175_s27, %s1798_s4 }
  0x66   : > { %p1178_p8 = pnand %p1176_p2, %p1491_p13 }
  0x68   : > { %p1179_p6 = pneg %p1178_p8 }
  0x6a   : > { %p1184_p3 = pnand %p1182_p10, %p1179_p6 }
  0x6c   : > { %1187 = shalt.err (!%p1184_p3)
}
  0x6d   : > { %s1188_s16 = scalar_lea.vmem %s264_s8, 256  ;;  %p1196_p12 = scmp.lt.s32.totalorder %s264_s8, %s264_s8 }
  0x6e   : > { %p1189_p5 = scmp.ne.s32.totalorder %s264_s8, %s1188_s16  ;;  %p1197_p0 = scmp.lt.s32.totalorder %s1188_s16, %s1188_s16 }
  0x70   : > { %p1191_p7 = pnand %p1189_p5, %p1491_p13  ;;  %p1198_p1 = por %p1197_p0, %p1196_p12 }
  0x72   : > { %p1192_p9 = pneg %p1191_p7 }
  0x74   : > { %p1199_p4 = pnand %p1198_p1, %p1192_p9 }
  0x76   : > { %1202 = shalt.err (!%p1199_p4)
}
  0x77   : > { %969 = dma.hbm_to_vmem [thread:$0]  (!%p1475_p11), %s1798_s4, 256, %s264_s8, [#allocation9], %s1364_s14, %s1364_s14, %s1365_s17  }
  0x78   : > { %s39_s28 = sadd.s32 1, %s1353_s25  ;;  %s48_s21 = sadd.s32 1, %s1345_s23 }
  0x79   : > { %p41_p13 = scmp.ge.s32.totalorder %s39_s28, 2  ;;  %p55_p2 = scmp.ne.s32.totalorder %s1345_s23, %s1341_s22 }
  0x7a   : > { %p56_p8 = scmp.eq.s32.totalorder %s1357_s26, 0  ;;  %p985_p6 = scmp.lt.s32.totalorder %s1357_s26, 2 }
  0x7b   : > { %s1839_s28 = smov (%p41_p13, %s39_s28), 0  ;;  %p1821_p3 = scmp.ne.s32.totalorder %s1813_s30, 0 }
  0x7c   : > { %p57_p10 = por %p56_p8, %p55_p2  ;;  %s43_s19 = ssub.s32 %s1353_s25, %s1839_s28 }
  0x7d   : > { %p1582_p5 = por %p1821_p3, %p55_p2  ;;  %s1589_s20 = sand.u32 1, %s1345_s23  }
  0x7e   : > { %p46_p11 = scmp.eq.s32.totalorder %s43_s19, 0  ;;  %s903_s14 = sshll.u32 %s1589_s20, 5 }
  0x7f   : > { %s932_s17 = sshll.u32 %s1353_s25, 9  ;;  %s1823_s0 = sld [smem:[#allocation21_spill]] }
  0x80   : > { %s1594_s8 = scalar_select %p46_p11, %s1345_s23, %s48_s21  }
  0x81   : > { %s281_s13 = scalar_lea.vmem [#allocation2], %s903_s14  ;;  %p1607_p7 = pnand %p985_p6, %p57_p10 }
  0x82   : > { %s290_s15 = sshll.u32 %s281_s13, 4  ;;  %s278_s16 = scalar_lea.sflag [#allocation3], %s1589_s20  ;;  %s1611_s15 = int_to_ptr.vmem [resolvable:$true] %s290_s15 }
  0x83   : > { %p1205_p12 = pneg %p1607_p7 }
  0x85   : > { %s1601_s30 = scalar_lea.hbm %s1823_s0, %s932_s17  ;;  %s1208_s19 = scalar_lea.hbm %s1823_s0, 1024 }
  0x86   : > { %s1203_s18 = scalar_lea.hbm %s1601_s30, 512  ;;  %p1209_p4 = scmp.lt.u32.totalorder %s1601_s30, %s1823_s0 }
  0x87   : > { %p1204_p9 = scmp.ne.s32.totalorder %s1601_s30, %s1203_s18  ;;  %p1210_p13 = scmp.lt.u32.totalorder %s1208_s19, %s1203_s18 }
  0x88   : > { %p1212_p8 = scmp.lt.u32.totalorder %s1203_s18, %s1601_s30 }
  0x89   : > { %p1206_p0 = pnand %p1205_p12, %p1204_p9  ;;  %p1211_p2 = por %p1210_p13, %p1209_p4 }
  0x8b   : > { %p1207_p1 = pneg %p1206_p0  ;;  %p1213_p6 = por %p1212_p8, %p1211_p2 }
  0x8d   : > { %p1214_p10 = pnand %p1213_p6, %p1207_p1 }
  0x8f   : > { %1217 = shalt.err (!%p1214_p10)
}
  0x90   : > { %s1218_s13 = scalar_lea.vmem %s1611_s15, 512  ;;  %s1367_s6 = smov [#allocation2]  }
  0x91   : > { %p1219_p3 = scmp.ne.s32.totalorder %s1611_s15, %s1218_s13  ;;  %s1223_s21 = sshll.u32 %s1367_s6, 4  ;;  %s1224_s21 = int_to_ptr.vmem [resolvable:$false] %s1223_s21 }
  0x92   : > { %s1225_s27 = scalar_lea.vmem %s1224_s21, 1024  ;;  %p1226_p0 = scmp.lt.s32.totalorder %s1611_s15, %s1224_s21 }
  0x93   : > { %p1221_p11 = pnand %p1219_p3, %p1205_p12  ;;  %p1227_p4 = scmp.lt.s32.totalorder %s1225_s27, %s1218_s13 }
  0x95   : > { %p1222_p9 = pneg %p1221_p11  ;;  %p1228_p13 = por %p1227_p4, %p1226_p0 }
  0x97   : > { %p1229_p2 = pnand %p1228_p13, %p1222_p9 }
  0x99   : > { %1232 = shalt.err (!%p1229_p2)
}
  0x9a   : > { %s1368_s18 = smov 256   ;;  %s1369_s19 = smov 16  }
  0x9b   : > { %973 = dma.hbm_to_vmem [thread:$0]  (!%p1607_p7), %s1601_s30, 512, %s1611_s15, %s278_s16, %s1368_s18, %s1368_s18, %s1369_s19  }
  0x9c   : > { %s1649_s6 = scalar_lea.hbm %s1799_s5, %s932_s17  ;;  %s304_s21 = scalar_lea.vmem [#allocation11], %s903_s14 }
  0x9d   : > { %s313_s27 = sshll.u32 %s304_s21, 4  ;;  %s301_s0 = scalar_lea.sflag [#allocation12], %s1589_s20  ;;  %s1653_s27 = int_to_ptr.vmem [resolvable:$true] %s313_s27 }
  0x9e   : > { %s1233_s1 = scalar_lea.hbm %s1649_s6, 512  ;;  %s1238_s17 = scalar_lea.hbm %s1799_s5, 1024 }
  0x9f   : > { %p1234_p1 = scmp.ne.s32.totalorder %s1649_s6, %s1233_s1  ;;  %p1239_p10 = scmp.lt.u32.totalorder %s1649_s6, %s1799_s5 }
  0xa0   : > { %p1240_p3 = scmp.lt.u32.totalorder %s1238_s17, %s1233_s1  ;;  %p1242_p9 = scmp.lt.u32.totalorder %s1233_s1, %s1649_s6 }
  0xa1   : > { %p1236_p8 = pnand %p1234_p1, %p1205_p12 }
  0xa2   : > { %p1241_p11 = por %p1240_p3, %p1239_p10 }
  0xa3   : > { %p1237_p6 = pneg %p1236_p8 }
  0xa4   : > { %p1243_p0 = por %p1242_p9, %p1241_p11 }
  0xa6   : > { %p1244_p4 = pnand %p1243_p0, %p1237_p6 }
  0xa8   : > { %1247 = shalt.err (!%p1244_p4)
}
  0xa9   : > { %s1248_s14 = scalar_lea.vmem %s1653_s27, 512  ;;  %s1370_s13 = smov [#allocation11]  }
  0xaa   : > { %p1249_p13 = scmp.ne.s32.totalorder %s1653_s27, %s1248_s14  ;;  %s1253_s21 = sshll.u32 %s1370_s13, 4  ;;  %s1254_s21 = int_to_ptr.vmem [resolvable:$false] %s1253_s21 }
  0xab   : > { %s1255_s30 = scalar_lea.vmem %s1254_s21, 1024  ;;  %p1256_p8 = scmp.lt.s32.totalorder %s1653_s27, %s1254_s21 }
  0xac   : > { %p1251_p2 = pnand %p1249_p13, %p1205_p12  ;;  %p1257_p10 = scmp.lt.s32.totalorder %s1255_s30, %s1248_s14 }
  0xae   : > { %p1252_p1 = pneg %p1251_p2  ;;  %p1258_p3 = por %p1257_p10, %p1256_p8 }
  0xb0   : > { %p1259_p11 = pnand %p1258_p3, %p1252_p1 }
  0xb2   : > { %1262 = shalt.err (!%p1259_p11)
}
  0xb3   : > { %976 = dma.hbm_to_vmem [thread:$0]  (!%p1607_p7), %s1649_s6, 512, %s1653_s27, %s301_s0, %s1368_s18, %s1368_s18, %s1369_s19  }
  0xb4   : > { %p1825_p12 = scmp.ne.s32.totalorder %s1817_s9, 0 }
  0xb5   : > { %s1687_s1 = sand.u32 (!%p1825_p12), 1, %s1341_s22   ;;  %p1826_p6 = scmp.ne.s32.totalorder (!%p1825_p12), %s1814_s7, 0 }
  0xb6   : > { %325 = sbr.rel (%p1825_p12) target bundleno = 702 (0x2be), region = 44  ;;  %s1690_s15 = sshll.u32 (!%p1825_p12), %s1687_s1, 5 }
  0xb7   : > { %s328_s11 = scalar_lea.sflag (!%p1825_p12), [#allocation3], %s1687_s1  ;;  %s331_s17 = scalar_lea.vmem (!%p1825_p12), [#allocation2], %s1690_s15 }
  0xbd   : > { %1316 = dma.done.wait (%p1826_p6), %s328_s11, 512  }
  0xbe   : > { %1318 = vsyncadd (%p1826_p6), %s328_s11, 4294966784  ;;  %p1827_p7 = scmp.ne.s32.totalorder %s1812_s29, 0 }
  0xc0   : > { %1320 = dma.done.wait (%p1827_p7), [#allocation6], 1536  }
  0xc1   : > { %1322 = vsyncadd (%p1827_p7), [#allocation6], 4294965760 }
  0xc2   : > { %1324 = dma.done.wait (%p1827_p7), [#allocation9], 384  }
  0xc3   : > { %1326 = vsyncadd (%p1827_p7), [#allocation9], 4294966912  ;;  %s353_s0 = scalar_lea.sflag [#allocation12], %s1687_s1  ;;  %s1708_s9 = scalar_lea.vmem [#allocation11], %s1690_s15 }
  0xc4   : > { %1328 = dma.done.wait (%p1826_p6), %s353_s0, 512  }
  0xc5   : > { %1330 = vsyncadd (%p1826_p6), %s353_s0, 4294966784  ;;  %v1371_v0 = vmov 0   ;;  %v395_v1 = vld [vmem:[%s331_s17 + $0x8] sm:$0xff]  ;;  %v397_v2 = vld [vmem:[%s331_s17 + $0x18] sm:$0xff]  ;;  %vm476_vm0 = vcmask 130048   ;;  %vm669_vm1 = vcmask 523264  }
  0xc6   : > { %521 = vmatprep.mubr.bf16.mxu0 %v1371_v0  ;;  %1052 = vset.pattern.permute.xlu0 %v1371_v0  ;;  %v394_v3 = vld [vmem:[%s331_s17] sm:$0xff]  ;;  %v399_v4 = vpack.c.bf16 %v397_v2, %v395_v1  ;;  %v396_v5 = vld [vmem:[%s331_s17 + $0x10] sm:$0xff]  ;;  %v409_v10 = vld [vmem:[#allocation7 + $0x8] sm:$0xff]  ;;  %s389_s29 = scalar_lea.vmem [#allocation13], %s1690_s15  ;;  %s934_s20 = sshll.u32 %s1349_s24, 9 }
  0xc7   : > { %1053 = vset.pattern.permute.xlu1 %v1371_v0  ;;  %705 = vmatprep.mubr.bf16.mxu1 %v1371_v0  ;;  %v398_v6 = vpack.c.bf16 %v396_v5, %v394_v3  ;;  %v1054_v7 = vld [vmem:[#allocation5] sm:$0xff]   ;;  %v410_v9 = vld [vmem:[#allocation7 + $0x10] sm:$0xff]  ;;  %v411_v11 = vld [vmem:[#allocation7 + $0x18] sm:$0xff]  ;;  %s744_s7 = sshll.u32 %s389_s29, 4  ;;  %s1828_s6 = sld [smem:[#allocation23_spill]]  ;;  %s1740_s7 = int_to_ptr.vmem [resolvable:$true] %s744_s7 }
  0xc8   : > { %489 = vmatprep.subr.bf16.mxu0 %v399_v4  ;;  %v408_v8 = vld [vmem:[#allocation7] sm:$0xff]  ;;  %428 = vperm.xlu1 %1053, %v410_v9   ;;  %v1055_v12 = vld [vmem:[#allocation5 + $0x8] sm:$0xff]   ;;  %v414_v15 = vld [vmem:[#allocation7 + $0x30] sm:$0xff]  ;;  %s729_s24 = scalar_lea.sflag [#allocation4], %s1687_s1  ;;  %s1263_s16 = scalar_lea.vmem %s1740_s7, 512 }
  0xc9   : > { %490 = vmatpush1.bf16.msra.mxu0 %v398_v6  ;;  %418 = vperm.xlu0 %1052, %v408_v8   ;;  %v412_v13 = vld [vmem:[#allocation7 + $0x20] sm:$0xff]  ;;  %v413_v14 = vld [vmem:[#allocation7 + $0x28] sm:$0xff]  ;;  %v415_v16 = vld [vmem:[#allocation7 + $0x38] sm:$0xff]  ;;  %p1264_p9 = scmp.ne.s32.totalorder %s1740_s7, %s1263_s16  ;;  %s1372_s10 = smov [#allocation13]  }
  0xca   : > { %v1056_v17 = vld [vmem:[#allocation5 + $0x10] sm:$0xff]   ;;  %v652_v18 = vld [vmem:[#allocation10] sm:$0xff]  ;;  %v1057_v20 = vld [vmem:[#allocation5 + $0x18] sm:$0xff]   ;;  %s1267_s14 = sshll.u32 %s1372_s10, 4  ;;  %s1268_s14 = int_to_ptr.vmem [resolvable:$false] %s1267_s14 }
  0xcb   : > { %v653_v19 = vld [vmem:[#allocation10 + $0x8] sm:$0xff]  ;;  %p1265_p0 = pnand %p1264_p9, %p1582_p5  ;;  %s1269_s13 = scalar_lea.vmem %s1268_s14, 1024 }
  0xcc   : > { %921 = vmatmul.mubr.msk.bf16.vlgmr.msra.gmra.mrb[0].mxu0 %vm476_vm0, %v1054_v7  ;;  %433 = vperm.xlu1 %1053, %v411_v11   ;;  %p1270_p13 = scmp.lt.s32.totalorder %s1740_s7, %s1268_s14  ;;  %p1271_p2 = scmp.lt.s32.totalorder %s1269_s13, %s1263_s16 }
  0xcd   : > { %531 = vmatprep.mubr.bf16.mxu0 %v1371_v0  ;;  %423 = vperm.xlu0 %1052, %v409_v10   ;;  %s1745_s27 = scalar_lea.hbm %s1828_s6, %s934_s20  ;;  %p1266_p4 = pneg %p1265_p0 }
  0xce   : > { %p1272_p1 = por %p1271_p2, %p1270_p13 }
  0xd0   : > { %443 = vperm.xlu1 %1053, %v413_v14   ;;  %p1273_p8 = pnand %p1272_p1, %p1266_p4 }
  0xd1   : > { %438 = vperm.xlu0 %1052, %v412_v13  }
  0xd4   : > { %922 = vmatmul.mubr.msk.bf16.gmra.mrb[4].mxu0 %vm476_vm0, %v1055_v12  ;;  %453 = vperm.xlu1 %1053, %v415_v16  }
  0xd5   : > { %541 = vmatprep.mubr.bf16.mxu0 %v1371_v0  ;;  %448 = vperm.xlu0 %1052, %v414_v15  }
  0xd8   : > { %661 = vperm.xlu1 %1053, %v653_v19  }
  0xd9   : > { %656 = vperm.xlu0 %1052, %v652_v18  }
  0xdc   : > { %923 = vmatmul.mubr.msk.bf16.gmra.mrb[8].mxu0 %vm476_vm0, %v1056_v17 }
  0xdd   : > { %551 = vmatprep.mubr.bf16.mxu0 %v1371_v0 }
  0xe4   : > { %924 = vmatmul.mubr.msk.bf16.gmra.mrb[12].mxu0 %vm476_vm0, %v1057_v20 }
 0x147   : > { %v429_v31 = vpop.permute.xlu1 %428 }
 0x148   : > { %v419_v21 = vpop.permute.xlu0 %418 }
 0x14b   : > { %v434_v39 = vpop.permute.xlu1 %433 }
 0x14c   : > { %v424_v25 = vpop.permute.xlu0 %423 }
 0x14f   : > { %v444_v59 = vpop.permute.xlu1 %443 }
 0x150   : > { %v439_v51 = vpop.permute.xlu0 %438 }
 0x154   : > { %v449_v18 = vpop.permute.xlu0 %448 }
 0x19f   : > { %v523_v22 = vpop.f32.mrb[0].mxu0 }
 0x1a0   : > { %v524_v23 = vadd.f32 %v523_v22, %v419_v21  ;;  %v525_v24 = vpop.f32.mrb[1].mxu0 }
 0x1a1   : > { %v526_v26 = vadd.f32 %v525_v24, %v419_v21  ;;  %v527_v27 = vpop.f32.mrb[2].mxu0 }
 0x1a2   : > { %v578_v28 = vmul.f32 0.70710677, %v524_v23  ;;  %v528_v29 = vadd.f32 %v527_v27, %v424_v25  ;;  %v529_v30 = vpop.f32.mrb[3].mxu0  ;;  %v562_v5 = vmul.f32 0.5, %v524_v23 }
 0x1a3   : > { %v579_v32 = vmul.f32 0.70710677, %v526_v26  ;;  %v530_v33 = vadd.f32 %v529_v30, %v424_v25  ;;  %v563_v58 = vmul.f32 0.5, %v526_v26 }
 0x1a4   : > { %1059 = verf.f32 %v578_v28  ;;  %v580_v34 = vmul.f32 0.70710677, %v528_v29  ;;  %v564_v6 = vmul.f32 0.5, %v528_v29 }
 0x1a5   : > { %1061 = verf.f32 %v579_v32  ;;  %v581_v35 = vmul.f32 0.70710677, %v530_v33  ;;  %v565_v0 = vmul.f32 0.5, %v530_v33  ;;  %v454_v33 = vpop.permute.xlu1 %453 }
 0x1a6   : > { %1063 = verf.f32 %v580_v34 }
 0x1a7   : > { %1065 = verf.f32 %v581_v35  ;;  %v533_v36 = vpop.f32.mrb[4].mxu0 }
 0x1a8   : > { %v534_v37 = vadd.f32 %v533_v36, %v429_v31  ;;  %v535_v38 = vpop.f32.mrb[5].mxu0 }
 0x1a9   : > { %v1718_v40 = vadd.f32 %v535_v38, %v429_v31  ;;  %v537_v41 = vpop.f32.mrb[6].mxu0 }
 0x1aa   : > { %v582_v42 = vmul.f32 0.70710677, %v534_v37  ;;  %v538_v43 = vadd.f32 %v537_v41, %v434_v39  ;;  %v539_v44 = vpop.f32.mrb[7].mxu0  ;;  %v566_v27 = vmul.f32 0.5, %v534_v37 }
 0x1ab   : > { %v583_v45 = vmul.f32 0.70710677, %v1718_v40  ;;  %v540_v46 = vadd.f32 %v539_v44, %v434_v39  ;;  %v567_v32 = vmul.f32 0.5, %v1718_v40 }
 0x1ac   : > { %1067 = verf.f32 %v582_v42  ;;  %v584_v47 = vmul.f32 0.70710677, %v538_v43  ;;  %v568_v28 = vmul.f32 0.5, %v538_v43 }
 0x1ad   : > { %1069 = verf.f32 %v583_v45  ;;  %v585_v48 = vmul.f32 0.70710677, %v540_v46  ;;  %v569_v34 = vmul.f32 0.5, %v540_v46 }
 0x1ae   : > { %v1060_v49 = vpop.eup %1059  ;;  %1071 = verf.f32 %v584_v47 }
 0x1af   : > { %v1062_v50 = vpop.eup %1061  ;;  %1073 = verf.f32 %v585_v48  ;;  %v543_v52 = vpop.f32.mrb[8].mxu0  ;;  %v610_v62 = vadd.f32 1.0, %v1060_v49 }
 0x1b0   : > { %v1064_v53 = vpop.eup %1063  ;;  %v1721_v54 = vadd.f32 %v543_v52, %v439_v51  ;;  %v545_v55 = vpop.f32.mrb[9].mxu0  ;;  %v611_v56 = vadd.f32 1.0, %v1062_v50 }
 0x1b1   : > { %v1066_v57 = vpop.eup %1065  ;;  %v1723_v60 = vadd.f32 %v545_v55, %v439_v51  ;;  %v547_v61 = vpop.f32.mrb[10].mxu0  ;;  %v612_v63 = vadd.f32 1.0, %v1064_v53  ;;  %v626_v13 = vmul.f32 %v610_v62, %v562_v5 }
 0x1b2   : > { %v586_v1 = vmul.f32 0.70710677, %v1721_v54  ;;  %v1726_v2 = vadd.f32 %v547_v61, %v444_v59  ;;  %v549_v3 = vpop.f32.mrb[11].mxu0  ;;  %v613_v4 = vadd.f32 1.0, %v1066_v57  ;;  %v627_v10 = vmul.f32 %v611_v56, %v563_v58 }
 0x1b3   : > { %v587_v7 = vmul.f32 0.70710677, %v1723_v60  ;;  %v550_v8 = vadd.f32 %v549_v3, %v444_v59  ;;  %v628_v14 = vmul.f32 %v612_v63, %v564_v6  ;;  %v570_v56 = vmul.f32 0.5, %v1721_v54 }
 0x1b4   : > { %1075 = verf.f32 %v586_v1  ;;  %v588_v9 = vmul.f32 0.70710677, %v1726_v2  ;;  %v629_v11 = vmul.f32 %v613_v4, %v565_v0  ;;  %v572_v57 = vmul.f32 0.5, %v1726_v2 }
 0x1b5   : > { %1077 = verf.f32 %v587_v7  ;;  %v589_v12 = vmul.f32 0.70710677, %v550_v8  ;;  %v644_v21 = vpack.c.bf16 %v628_v14, %v626_v13  ;;  %v571_v59 = vmul.f32 0.5, %v1723_v60 }
 0x1b6   : > { %v1068_v15 = vpop.eup %1067  ;;  %1079 = verf.f32 %v588_v9  ;;  %v645_v16 = vpack.c.bf16 %v629_v11, %v627_v10  ;;  %v573_v61 = vmul.f32 0.5, %v550_v8 }
 0x1b7   : > { %v1070_v17 = vpop.eup %1069  ;;  %v614_v19 = vadd.f32 1.0, %v1068_v15  ;;  %1081 = verf.f32 %v589_v12  ;;  %v553_v20 = vpop.f32.mrb[12].mxu0 }
 0x1b8   : > { %v1072_v22 = vpop.eup %1071  ;;  %v615_v23 = vadd.f32 1.0, %v1070_v17  ;;  %v554_v24 = vadd.f32 %v553_v20, %v449_v18  ;;  %v555_v25 = vpop.f32.mrb[13].mxu0  ;;  %673 = vmatprep.subr.bf16.mxu1 %v645_v16 }
 0x1b9   : > { %v1074_v26 = vpop.eup %1073  ;;  %v616_v29 = vadd.f32 1.0, %v1072_v22  ;;  %v556_v30 = vadd.f32 %v555_v25, %v449_v18  ;;  %v557_v31 = vpop.f32.mrb[14].mxu0  ;;  %674 = vmatpush1.bf16.msra.mxu1 %v644_v21  ;;  %v630_v39 = vmul.f32 %v614_v19, %v566_v27  ;;  %v1058_v21 = vld [vmem:[#allocation8] sm:$0xff]  }
 0x1ba   : > { %v617_v35 = vadd.f32 1.0, %v1074_v26  ;;  %v590_v36 = vmul.f32 0.70710677, %v554_v24  ;;  %v559_v38 = vpop.f32.mrb[15].mxu0  ;;  %v558_v44 = vadd.f32 %v557_v31, %v454_v33  ;;  %v631_v45 = vmul.f32 %v615_v23, %v567_v32  ;;  %v657_v22 = vpop.permute.xlu0 %656  ;;  %v717_v27 = vld [vmem:[%s1708_s9 + $0x8] sm:$0xff]  ;;  %v718_v31 = vld [vmem:[%s1708_s9 + $0x10] sm:$0xff] }
 0x1bb   : > { %v632_v41 = vmul.f32 %v616_v29, %v568_v28  ;;  %v591_v42 = vmul.f32 0.70710677, %v556_v30  ;;  %v560_v37 = vadd.f32 %v559_v38, %v454_v33  ;;  %v574_v11 = vmul.f32 0.5, %v554_v24  ;;  %v716_v24 = vld [vmem:[%s1708_s9] sm:$0xff]  ;;  %v662_v28 = vpop.permute.xlu1 %661 }
 0x1bc   : > { %v633_v47 = vmul.f32 %v617_v35, %v569_v34  ;;  %1083 = verf.f32 %v590_v36  ;;  %v592_v43 = vmul.f32 0.70710677, %v558_v44  ;;  %v576_v12 = vmul.f32 0.5, %v558_v44  ;;  %v719_v35 = vld [vmem:[%s1708_s9 + $0x18] sm:$0xff] }
 0x1bd   : > { %1085 = verf.f32 %v591_v42  ;;  %v646_v48 = vpack.c.bf16 %v632_v41, %v630_v39  ;;  %v593_v50 = vmul.f32 0.70710677, %v560_v37  ;;  %v575_v60 = vmul.f32 0.5, %v556_v30 }
 0x1be   : > { %v1076_v49 = vpop.eup %1075  ;;  %v647_v51 = vpack.c.bf16 %v633_v47, %v631_v45  ;;  %1087 = verf.f32 %v592_v43  ;;  %v577_v8 = vmul.f32 0.5, %v560_v37 }
 0x1bf   : > { %v1078_v40 = vpop.eup %1077  ;;  %v618_v52 = vadd.f32 1.0, %v1076_v49  ;;  %1089 = verf.f32 %v593_v50 }
 0x1c0   : > { %v1080_v46 = vpop.eup %1079  ;;  %v619_v53 = vadd.f32 1.0, %v1078_v40  ;;  %675 = vmatprep.subr.bf16.mxu1 %v647_v51 }
 0x1c1   : > { %v1082_v55 = vpop.eup %1081  ;;  %v620_v58 = vadd.f32 1.0, %v1080_v46  ;;  %676 = vmatpush1.bf16.msra.mxu1 %v646_v48  ;;  %v634_v63 = vmul.f32 %v618_v52, %v570_v56 }
 0x1c2   : > { %v621_v62 = vadd.f32 1.0, %v1082_v55  ;;  %v635_v1 = vmul.f32 %v619_v53, %v571_v59 }
 0x1c3   : > { %v636_v0 = vmul.f32 %v620_v58, %v572_v57 }
 0x1c4   : > { %v637_v3 = vmul.f32 %v621_v62, %v573_v61 }
 0x1c5   : > { %v648_v4 = vpack.c.bf16 %v636_v0, %v634_v63 }
 0x1c6   : > { %v1084_v5 = vpop.eup %1083  ;;  %v649_v6 = vpack.c.bf16 %v637_v3, %v635_v1 }
 0x1c7   : > { %v1086_v7 = vpop.eup %1085  ;;  %v622_v9 = vadd.f32 1.0, %v1084_v5 }
 0x1c8   : > { %677 = vmatprep.subr.bf16.mxu1 %v649_v6  ;;  %v1088_v10 = vpop.eup %1087  ;;  %v623_v54 = vadd.f32 1.0, %v1086_v7 }
 0x1c9   : > { %678 = vmatpush1.bf16.msra.mxu1 %v648_v4  ;;  %v1090_v2 = vpop.eup %1089  ;;  %v624_v13 = vadd.f32 1.0, %v1088_v10  ;;  %v638_v15 = vmul.f32 %v622_v9, %v574_v11 }
 0x1ca   : > { %v625_v14 = vadd.f32 1.0, %v1090_v2  ;;  %v639_v17 = vmul.f32 %v623_v54, %v575_v60 }
 0x1cb   : > { %v640_v16 = vmul.f32 %v624_v13, %v576_v12 }
 0x1cc   : > { %v641_v18 = vmul.f32 %v625_v14, %v577_v8 }
 0x1cd   : > { %v650_v19 = vpack.c.bf16 %v640_v16, %v638_v15 }
 0x1ce   : > { %v651_v20 = vpack.c.bf16 %v641_v18, %v639_v17 }
 0x1d0   : > { %679 = vmatprep.subr.bf16.mxu1 %v651_v20 }
 0x1d1   : > { %680 = vmatpush1.bf16.msra.mxu1 %v650_v19 }
 0x1d4   : > { %926 = vmatmul.mubr.msk.bf16.vlgmr.msra.gmra.mrb[0].mxu1 %vm669_vm1, %v1058_v21 }
 0x2a7   : > { %v707_v23 = vpop.f32.mrb[0].mxu1 }
 0x2a8   : > { %v708_v25 = vadd.f32 %v707_v23, %v657_v22  ;;  %v709_v26 = vpop.f32.mrb[1].mxu1 }
 0x2a9   : > { %v710_v29 = vadd.f32 %v709_v26, %v657_v22  ;;  %v711_v30 = vpop.f32.mrb[2].mxu1 }
 0x2aa   : > { %v720_v32 = vadd.f32 %v716_v24, %v708_v25  ;;  %v712_v33 = vadd.f32 %v711_v30, %v662_v28  ;;  %v713_v34 = vpop.f32.mrb[3].mxu1 }
 0x2ab   : > { %v721_v36 = vadd.f32 %v717_v27, %v710_v29  ;;  %v714_v38 = vadd.f32 %v713_v34, %v662_v28 }
 0x2ac   : > { %724 = vst [vmem:[%s389_s29] sm:$0xff] %v720_v32  ;;  %v722_v39 = vadd.f32 %v718_v31, %v712_v33 }
 0x2ad   : > { %725 = vst [vmem:[%s389_s29 + $0x8] sm:$0xff] %v721_v36  ;;  %v723_v41 = vadd.f32 %v719_v35, %v714_v38 }
 0x2ae   : > { %726 = vst [vmem:[%s389_s29 + $0x10] sm:$0xff] %v722_v39 }
 0x2af   : > { %727 = vst [vmem:[%s389_s29 + $0x18] sm:$0xff] %v723_v41 }
 0x2b0   : > { %1276 = shalt.err (!%p1273_p8)
}
 0x2b1   : > { %s1277_s21 = scalar_lea.hbm %s1745_s27, 512  ;;  %s1281_s11 = scalar_lea.hbm %s1828_s6, 1024 }
 0x2b2   : > { %p1278_p10 = scmp.ne.s32.totalorder %s1745_s27, %s1277_s21  ;;  %p1282_p12 = scmp.lt.u32.totalorder %s1745_s27, %s1828_s6 }
 0x2b3   : > { %p1283_p6 = scmp.lt.u32.totalorder %s1281_s11, %s1277_s21  ;;  %p1285_p9 = scmp.lt.u32.totalorder %s1277_s21, %s1745_s27 }
 0x2b4   : > { %p1279_p3 = pnand %p1278_p10, %p1582_p5 }
 0x2b5   : > { %p1284_p7 = por %p1283_p6, %p1282_p12 }
 0x2b6   : > { %p1280_p11 = pneg %p1279_p3 }
 0x2b7   : > { %p1286_p0 = por %p1285_p9, %p1284_p7 }
 0x2b9   : > { %p1287_p4 = pnand %p1286_p0, %p1280_p11 }
 0x2bb   : > { %1290 = shalt.err (!%p1287_p4)
}
 0x2bc   : > { %s1373_s9 = smov 256   ;;  %s1374_s29 = smov 16  }
 0x2bd   : > { %955 = dma.vmem_to_hbm [thread:$0]  (%p1582_p5), %s1740_s7, 512, %s1745_s27, %s729_s24, %s1373_s9, %s1373_s9, %s1374_s29  }
 0x2be PF: > { %s1829_s20 = sld [smem:[#allocation19_spill]]  ;;  %s1830_s18 = sld [smem:[#allocation20_spill]] }
 0x2bf   : > { %p1832_p2 = scmp.ge.s32.totalorder %s1357_s26, 2 }
 0x2c4   : > { %s759_s19 = sand.u32 1, %s1829_s20   ;;  %p1831_p13 = scmp.ne.s32.totalorder %s1830_s18, 0 }
 0x2c5   : > { %s760_s16 = scalar_lea.sflag [#allocation4], %s759_s19 }
 0x2c6   : > { %p978_p1 = pnand %p1832_p2, %p1831_p13 }
 0x2c8   : > { %1332 = dma.done.wait (!%p978_p1), %s760_s16, 512  }
 0x2c9   : > { %1334 = vsyncadd (!%p978_p1), %s760_s16, 4294966784  ;;  %s27_s26 = sadd.s32 1, %s1357_s26   ;;  %s1833_s21 = smov %s1341_s22 }
 0x2ca   : > { %p24_p8 = scmp.ge.s32.totalorder %s27_s26, 4   ;;  %s1834_s22 = smov %s1345_s23 }
 0x2cb   : > { %s1835_s23 = smov %s1594_s8  ;;  %s1836_s24 = smov %s1353_s25 }
 0x2cc   : > { %s1837_s25 = smov %s1839_s28  ;;  %26 = sbr.rel (!%p24_p8) target bundleno = 14 (0xe), region = 118 }
 0x2d3   :  { %765 = vsyncpa [#allocation3], 1 }
 0x2d4   :  { %767 = vsyncpa [#allocation3 + $0x1], 1 }
 0x2d5   :  { %768 = vsyncpa [#allocation6], 1 }
 0x2d6   :  { %769 = vsyncpa [#allocation9], 1 }
 0x2d7   :  { %770 = vsyncpa [#allocation12], 1 }
 0x2d8   :  { %772 = vsyncpa [#allocation12 + $0x1], 1 }
 0x2d9   :  { %773 = vsyncpa [#allocation4], 1 }
 0x2da   :  { %775 = vsyncpa [#allocation4 + $0x1], 1 }

</bundles_post_ra>
